<compile_context>
chip_gen: v6e
topology: v6e:2x2x1
jax: 0.10.0
libtpu: 0.0.40
codegen_flags: <defaults>
</compile_context>

<pallas_src>
import functools

import jax
import jax.numpy as jnp
from jax.experimental import pallas as pl
from jax.experimental.pallas import tpu as pltpu

K = 7
PAD = K // 2


def _round_up(x, m):
    return (x + m - 1) // m * m


def _pick_c_tile(C, H, W, itemsize=4, budget_bytes=4 * 1024 * 1024):
    """Largest divisor of C whose (tile, H, W) input block stays under budget."""
    max_tc = max(1, budget_bytes // max(1, H * W * itemsize))
    tc = 1
    for d in range(1, C + 1):
        if d > max_tc:
            break
        if C % d == 0:
            tc = d
    return tc


def _spatial_attention_kernel(x_ref, w_ref, o_ref, max_acc, sum_acc,
                              *, C, H, W, Hs, WP):
    # x_ref   : (1, TC, H, W)  VMEM tile (batch b, channels [k*TC, (k+1)*TC))
    # w_ref   : (2*K*K,)       SMEM conv weights, [channel, ky, kx] row-major
    # o_ref   : (1, 1, H, W)   VMEM output tile (resident across the k axis)
    # max_acc : (Hs, WP) f32   running channel max; data at [0:H, 0:W]
    # sum_acc : (Hs, WP) f32   running channel sum; same placement
    # Rows [H:Hs) and lanes [W:WP) are zeroed once per batch element and never
    # rewritten; they provide the conv zero padding via circular rolls.
    k = pl.program_id(1)
    nk = pl.num_programs(1)

    xb = x_ref[0].astype(jnp.float32)          # (TC, H, W) per-chunk cast
    blk_max = jnp.max(xb, axis=0)              # (H, W)
    blk_sum = jnp.sum(xb, axis=0)              # (H, W)

    @pl.when(k == 0)
    def _init():
        # Zero once per batch element (the halo is never touched afterwards);
        # the interior is immediately overwritten with this tile's partials,
        # so the running max never sees the 0 init.
        max_acc[...] = jnp.zeros_like(max_acc)
        sum_acc[...] = jnp.zeros_like(sum_acc)
        max_acc[0:H, 0:W] = blk_max
        sum_acc[0:H, 0:W] = blk_sum

    @pl.when(k > 0)
    def _update():
        # Aligned (origin-anchored) read-modify-write in the hot loop.
        max_acc[0:H, 0:W] = jnp.maximum(max_acc[0:H, 0:W], blk_max)
        sum_acc[0:H, 0:W] = sum_acc[0:H, 0:W] + blk_sum

    @pl.when(k == nk - 1)
    def _finalize():
        inv_c = float(1.0 / C)                 # true channel count for the mean
        # Conv input channel order matches torch.cat([max_out, avg_out], dim=1).
        # Single whole-plane scale (halo stays zero: 0 * inv_c == 0).
        planes = (max_acc[...], sum_acc[...] * inv_c)
        acc = jnp.zeros((Hs, WP), jnp.float32)
        for c in range(2):
            plane = planes[c]
            for dy in range(K):
                # One circular sublane rotation per (c, dy); out-of-range rows
                # come from the zero row-halo.  Shared across the 7 dx taps.
                sh_r = (PAD - dy) % Hs
                rows = plane if sh_r == 0 else pltpu.roll(plane, sh_r, axis=0)
                for dx in range(K):
                    # Circular lane rotation; wrap lands in the zero lane-halo.
                    sh_l = (PAD - dx) % WP
                    shifted = rows if sh_l == 0 else pltpu.roll(rows, sh_l, axis=1)
                    acc = acc + shifted * w_ref[c * (K * K) + dy * K + dx]
        conv = acc[0:H, 0:W]
        # Exact sigmoid: the epilogue is O(H*W) once per batch element, so the
        # f32 divide is off the critical path.
        o_ref[0, 0] = (1.0 / (1.0 + jnp.exp(-conv))).astype(o_ref.dtype)


def spatial_attention(x, weight, *, c_tile=None):
    """x: (B, C, H, W); weight: (1, 2, 7, 7) OIHW, no bias. Returns (B, 1, H, W)."""
    B, C, H, W = x.shape
    assert weight.shape == (1, 2, K, K)

    if c_tile is None:
        c_tile = _pick_c_tile(C, H, W, itemsize=x.dtype.itemsize)
    if C % c_tile != 0:
        raise ValueError(f"c_tile={c_tile} must divide C={C}")
    nk = C // c_tile

    # Scratch planes: data anchored at the origin, PAD extra rows / lanes of
    # zero halo at the end (circular rolls reach both conv directions through
    # the same trailing halo).  Lanes padded to a multiple of 128.
    Hs = _round_up(H + PAD, 8)
    WP = max(128, _round_up(W + PAD, 128))

    w_flat = weight.astype(jnp.float32).reshape(2 * K * K)

    kernel = functools.partial(_spatial_attention_kernel,
                               C=C, H=H, W=W, Hs=Hs, WP=WP)

    return pl.pallas_call(
        kernel,
        out_shape=jax.ShapeDtypeStruct((B, 1, H, W), x.dtype),
        grid_spec=pltpu.PrefetchScalarGridSpec(
            num_scalar_prefetch=0,
            grid=(B, nk),                      # channel-reduction axis last
            in_specs=[
                pl.BlockSpec((1, c_tile, H, W), lambda b, k: (b, k, 0, 0)),
                pl.BlockSpec(memory_space=pltpu.MemorySpace.SMEM),  # (98,) weights
            ],
            out_specs=pl.BlockSpec((1, 1, H, W), lambda b, k: (b, 0, 0, 0)),
            scratch_shapes=[
                pltpu.VMEM((Hs, WP), jnp.float32),   # running channel max
                pltpu.VMEM((Hs, WP), jnp.float32),   # running channel sum
            ],
        ),
        compiler_params=pltpu.CompilerParams(
            dimension_semantics=("parallel", "arbitrary"),
            vmem_limit_bytes=32 * 1024 * 1024,   # explicit; safe on v5e/v6e/v7x
        ),
    )(x, w_flat)


def spatial_attention_ref(x, weight):
    """Pure-JAX reference matching the PyTorch forward."""
    max_out = jnp.max(x, axis=1, keepdims=True)
    avg_out = jnp.mean(x, axis=1, keepdims=True)
    cat = jnp.concatenate([max_out, avg_out], axis=1)
    conv = jax.lax.conv_general_dilated(
        cat, weight, window_strides=(1, 1), padding="SAME",
        dimension_numbers=("NCHW", "OIHW", "NCHW"))
    return jax.nn.sigmoid(conv)


if __name__ == "__main__":
    key = jax.random.PRNGKey(0)
    kx, kw = jax.random.split(key)

    B, C, H, W = 2, 4, 16, 16
    x = jax.random.normal(kx, (B, C, H, W), dtype=jnp.float32)
    # deterministic "conv1" weights (shape from nn.Conv2d(2, 1, 7, bias=False))
    weight = 0.1 * jax.random.normal(kw, (1, 2, K, K), dtype=jnp.float32)

    ref = jax.block_until_ready(spatial_attention_ref(x, weight))

    # c_tile=2 -> two channel-reduction grid steps, exercising the running
    # max/sum accumulation path as well as the init/finalize phases.
    out = jax.block_until_ready(spatial_attention(x, weight, c_tile=2))
    assert out.shape == (B, 1, H, W)
    err = jnp.max(jnp.abs(out - ref))
    assert jnp.allclose(out, ref, atol=1e-5, rtol=1e-5), f"max abs err = {err}"

    # default c_tile -> single channel step (init + finalize in one iteration).
    out1 = jax.block_until_ready(spatial_attention(x, weight))
    err1 = jnp.max(jnp.abs(out1 - ref))
    assert jnp.allclose(out1, ref, atol=1e-5, rtol=1e-5), f"max abs err = {err1}"

    print("KERNEL_OK")
</pallas_src>

<mosaic_0001>
module attributes {stable_mosaic.version = 11 : i64} {
  func.func @_spatial_attention_kernel(%arg0: i32, %arg1: i32, %arg2: memref<1x2x16x16xf32, #tpu.memory_space<vmem>>, %arg3: memref<98xf32, #tpu.memory_space<smem>>, %arg4: memref<1x1x16x16xf32, #tpu.memory_space<vmem>>, %arg5: memref<24x128xf32, #tpu.memory_space<vmem>>, %arg6: memref<24x128xf32, #tpu.memory_space<vmem>>) attributes {dimension_semantics = [#tpu.dimension_semantics<parallel>, #tpu.dimension_semantics<arbitrary>], iteration_bounds = array<i64: 2, 2>, scalar_prefetch = 0 : i64, scratch_operands = 2 : i64, tpu.core_type = #tpu.core_type<tc>, window_params = [{transform_indices = @transform_0, window_bounds = array<i64: 1, 2, 16, 16>}, {transform_indices = @transform_1, window_bounds = array<i64: 98>}, {transform_indices = @transform_2, window_bounds = array<i64: 1, 1, 16, 16>}]} {
    %c0 = arith.constant 0 : index
    %c0_0 = arith.constant 0 : index
    %c0_1 = arith.constant 0 : index
    %c0_2 = arith.constant 0 : index
    %0 = vector.load %arg2[%c0, %c0_0, %c0_1, %c0_2] : memref<1x2x16x16xf32, #tpu.memory_space<vmem>>, vector<1x2x16x16xf32>
    %1 = vector.shape_cast %0 : vector<1x2x16x16xf32> to vector<2x16x16xf32>
    %cst = arith.constant dense<0xFF800000> : vector<16x16xf32>
    %2 = vector.multi_reduction <maximumf>, %1, %cst [0] : vector<2x16x16xf32> to vector<16x16xf32>
    %cst_3 = arith.constant dense<0.000000e+00> : vector<16x16xf32>
    %3 = vector.multi_reduction <add>, %1, %cst_3 [0] : vector<2x16x16xf32> to vector<16x16xf32>
    %c0_i32 = arith.constant 0 : i32
    %4 = arith.cmpi eq, %arg1, %c0_i32 : i32
    %5 = arith.extui %4 : i1 to i32
    %c0_i32_4 = arith.constant 0 : i32
    %6 = arith.cmpi ne, %5, %c0_i32_4 : i32
    scf.if %6 {
      %cst_8 = arith.constant 0.000000e+00 : f32
      %13 = vector.broadcast %cst_8 : f32 to vector<24x128xf32>
      %c0_9 = arith.constant 0 : index
      %c0_10 = arith.constant 0 : index
      %14 = vector.load %arg5[%c0_9, %c0_10] : memref<24x128xf32, #tpu.memory_space<vmem>>, vector<24x128xf32>
      tpu.vector_store %arg5[%c0_9, %c0_10], %13 {strides = array<i32>} : memref<24x128xf32, #tpu.memory_space<vmem>>, vector<24x128xf32>,
      %cst_11 = arith.constant 0.000000e+00 : f32
      %15 = vector.broadcast %cst_11 : f32 to vector<24x128xf32>
      %c0_12 = arith.constant 0 : index
      %c0_13 = arith.constant 0 : index
      %16 = vector.load %arg6[%c0_12, %c0_13] : memref<24x128xf32, #tpu.memory_space<vmem>>, vector<24x128xf32>
      tpu.vector_store %arg6[%c0_12, %c0_13], %15 {strides = array<i32>} : memref<24x128xf32, #tpu.memory_space<vmem>>, vector<24x128xf32>,
      %c0_14 = arith.constant 0 : index
      %c0_15 = arith.constant 0 : index
      %17 = vector.load %arg5[%c0_14, %c0_15] : memref<24x128xf32, #tpu.memory_space<vmem>>, vector<16x16xf32>
      tpu.vector_store %arg5[%c0_14, %c0_15], %2 {strides = array<i32>} : memref<24x128xf32, #tpu.memory_space<vmem>>, vector<16x16xf32>,
      %c0_16 = arith.constant 0 : index
      %c0_17 = arith.constant 0 : index
      %18 = vector.load %arg6[%c0_16, %c0_17] : memref<24x128xf32, #tpu.memory_space<vmem>>, vector<16x16xf32>
      tpu.vector_store %arg6[%c0_16, %c0_17], %3 {strides = array<i32>} : memref<24x128xf32, #tpu.memory_space<vmem>>, vector<16x16xf32>,
    } else {
    }
    %c0_i32_5 = arith.constant 0 : i32
    %7 = arith.cmpi sgt, %arg1, %c0_i32_5 : i32
    %8 = arith.extui %7 : i1 to i32
    %c0_i32_6 = arith.constant 0 : i32
    %9 = arith.cmpi ne, %8, %c0_i32_6 : i32
    scf.if %9 {
      %c0_8 = arith.constant 0 : index
      %c0_9 = arith.constant 0 : index
      %13 = vector.load %arg5[%c0_8, %c0_9] : memref<24x128xf32, #tpu.memory_space<vmem>>, vector<16x16xf32>
      %14 = arith.maximumf %13, %2 : vector<16x16xf32>
      %c0_10 = arith.constant 0 : index
      %c0_11 = arith.constant 0 : index
      %15 = vector.load %arg5[%c0_10, %c0_11] : memref<24x128xf32, #tpu.memory_space<vmem>>, vector<16x16xf32>
      tpu.vector_store %arg5[%c0_10, %c0_11], %14 {strides = array<i32>} : memref<24x128xf32, #tpu.memory_space<vmem>>, vector<16x16xf32>,
      %c0_12 = arith.constant 0 : index
      %c0_13 = arith.constant 0 : index
      %16 = vector.load %arg6[%c0_12, %c0_13] : memref<24x128xf32, #tpu.memory_space<vmem>>, vector<16x16xf32>
      %17 = arith.addf %16, %3 : vector<16x16xf32>
      %c0_14 = arith.constant 0 : index
      %c0_15 = arith.constant 0 : index
      %18 = vector.load %arg6[%c0_14, %c0_15] : memref<24x128xf32, #tpu.memory_space<vmem>>, vector<16x16xf32>
      tpu.vector_store %arg6[%c0_14, %c0_15], %17 {strides = array<i32>} : memref<24x128xf32, #tpu.memory_space<vmem>>, vector<16x16xf32>,
    } else {
    }
    %c1_i32 = arith.constant 1 : i32
    %10 = arith.cmpi eq, %arg1, %c1_i32 : i32
    %11 = arith.extui %10 : i1 to i32
    %c0_i32_7 = arith.constant 0 : i32
    %12 = arith.cmpi ne, %11, %c0_i32_7 : i32
    scf.if %12 {
      %c0_8 = arith.constant 0 : index
      %c0_9 = arith.constant 0 : index
      %13 = vector.load %arg5[%c0_8, %c0_9] : memref<24x128xf32, #tpu.memory_space<vmem>>, vector<24x128xf32>
      %c0_10 = arith.constant 0 : index
      %c0_11 = arith.constant 0 : index
      %14 = vector.load %arg6[%c0_10, %c0_11] : memref<24x128xf32, #tpu.memory_space<vmem>>, vector<24x128xf32>
      %cst_12 = arith.constant 2.500000e-01 : f32
      %15 = vector.broadcast %cst_12 : f32 to vector<24x128xf32>
      %16 = arith.mulf %14, %15 : vector<24x128xf32>
      %cst_13 = arith.constant 0.000000e+00 : f32
      %17 = vector.broadcast %cst_13 : f32 to vector<24x128xf32>
      %c3_i32 = arith.constant 3 : i32
      %18 = tpu.dynamic_rotate %13 by %c3_i32 dim 0 : vector<24x128xf32>, i32 -> vector<24x128xf32>
      %c3_i32_14 = arith.constant 3 : i32
      %19 = tpu.dynamic_rotate %18 by %c3_i32_14 dim 1 : vector<24x128xf32>, i32 -> vector<24x128xf32>
      %c0_15 = arith.constant 0 : index
      %20 = memref.load %arg3[%c0_15] : memref<98xf32, #tpu.memory_space<smem>>
      %21 = vector.broadcast %20 : f32 to vector<24x128xf32>
      %22 = arith.mulf %19, %21 : vector<24x128xf32>
      %23 = arith.addf %17, %22 : vector<24x128xf32>
      %c2_i32 = arith.constant 2 : i32
      %24 = tpu.dynamic_rotate %18 by %c2_i32 dim 1 : vector<24x128xf32>, i32 -> vector<24x128xf32>
      %c1 = arith.constant 1 : index
      %25 = memref.load %arg3[%c1] : memref<98xf32, #tpu.memory_space<smem>>
      %26 = vector.broadcast %25 : f32 to vector<24x128xf32>
      %27 = arith.mulf %24, %26 : vector<24x128xf32>
      %28 = arith.addf %23, %27 : vector<24x128xf32>
      %c1_i32_16 = arith.constant 1 : i32
      %29 = tpu.dynamic_rotate %18 by %c1_i32_16 dim 1 : vector<24x128xf32>, i32 -> vector<24x128xf32>
      %c2 = arith.constant 2 : index
      %30 = memref.load %arg3[%c2] : memref<98xf32, #tpu.memory_space<smem>>
      %31 = vector.broadcast %30 : f32 to vector<24x128xf32>
      %32 = arith.mulf %29, %31 : vector<24x128xf32>
      %33 = arith.addf %28, %32 : vector<24x128xf32>
      %c3 = arith.constant 3 : index
      %34 = memref.load %arg3[%c3] : memref<98xf32, #tpu.memory_space<smem>>
      %35 = vector.broadcast %34 : f32 to vector<24x128xf32>
      %36 = arith.mulf %18, %35 : vector<24x128xf32>
      %37 = arith.addf %33, %36 : vector<24x128xf32>
      %c127_i32 = arith.constant 127 : i32
      %38 = tpu.dynamic_rotate %18 by %c127_i32 dim 1 : vector<24x128xf32>, i32 -> vector<24x128xf32>
      %c4 = arith.constant 4 : index
      %39 = memref.load %arg3[%c4] : memref<98xf32, #tpu.memory_space<smem>>
      %40 = vector.broadcast %39 : f32 to vector<24x128xf32>
      %41 = arith.mulf %38, %40 : vector<24x128xf32>
      %42 = arith.addf %37, %41 : vector<24x128xf32>
      %c126_i32 = arith.constant 126 : i32
      %43 = tpu.dynamic_rotate %18 by %c126_i32 dim 1 : vector<24x128xf32>, i32 -> vector<24x128xf32>
      %c5 = arith.constant 5 : index
      %44 = memref.load %arg3[%c5] : memref<98xf32, #tpu.memory_space<smem>>
      %45 = vector.broadcast %44 : f32 to vector<24x128xf32>
      %46 = arith.mulf %43, %45 : vector<24x128xf32>
      %47 = arith.addf %42, %46 : vector<24x128xf32>
      %c125_i32 = arith.constant 125 : i32
      %48 = tpu.dynamic_rotate %18 by %c125_i32 dim 1 : vector<24x128xf32>, i32 -> vector<24x128xf32>
      %c6 = arith.constant 6 : index
      %49 = memref.load %arg3[%c6] : memref<98xf32, #tpu.memory_space<smem>>
      %50 = vector.broadcast %49 : f32 to vector<24x128xf32>
      %51 = arith.mulf %48, %50 : vector<24x128xf32>
      %52 = arith.addf %47, %51 : vector<24x128xf32>
      %c2_i32_17 = arith.constant 2 : i32
      %53 = tpu.dynamic_rotate %13 by %c2_i32_17 dim 0 : vector<24x128xf32>, i32 -> vector<24x128xf32>
      %c3_i32_18 = arith.constant 3 : i32
      %54 = tpu.dynamic_rotate %53 by %c3_i32_18 dim 1 : vector<24x128xf32>, i32 -> vector<24x128xf32>
      %c7 = arith.constant 7 : index
      %55 = memref.load %arg3[%c7] : memref<98xf32, #tpu.memory_space<smem>>
      %56 = vector.broadcast %55 : f32 to vector<24x128xf32>
      %57 = arith.mulf %54, %56 : vector<24x128xf32>
      %58 = arith.addf %52, %57 : vector<24x128xf32>
      %c2_i32_19 = arith.constant 2 : i32
      %59 = tpu.dynamic_rotate %53 by %c2_i32_19 dim 1 : vector<24x128xf32>, i32 -> vector<24x128xf32>
      %c8 = arith.constant 8 : index
      %60 = memref.load %arg3[%c8] : memref<98xf32, #tpu.memory_space<smem>>
      %61 = vector.broadcast %60 : f32 to vector<24x128xf32>
      %62 = arith.mulf %59, %61 : vector<24x128xf32>
      %63 = arith.addf %58, %62 : vector<24x128xf32>
      %c1_i32_20 = arith.constant 1 : i32
      %64 = tpu.dynamic_rotate %53 by %c1_i32_20 dim 1 : vector<24x128xf32>, i32 -> vector<24x128xf32>
      %c9 = arith.constant 9 : index
      %65 = memref.load %arg3[%c9] : memref<98xf32, #tpu.memory_space<smem>>
      %66 = vector.broadcast %65 : f32 to vector<24x128xf32>
      %67 = arith.mulf %64, %66 : vector<24x128xf32>
      %68 = arith.addf %63, %67 : vector<24x128xf32>
      %c10 = arith.constant 10 : index
      %69 = memref.load %arg3[%c10] : memref<98xf32, #tpu.memory_space<smem>>
      %70 = vector.broadcast %69 : f32 to vector<24x128xf32>
      %71 = arith.mulf %53, %70 : vector<24x128xf32>
      %72 = arith.addf %68, %71 : vector<24x128xf32>
      %c127_i32_21 = arith.constant 127 : i32
      %73 = tpu.dynamic_rotate %53 by %c127_i32_21 dim 1 : vector<24x128xf32>, i32 -> vector<24x128xf32>
      %c11 = arith.constant 11 : index
      %74 = memref.load %arg3[%c11] : memref<98xf32, #tpu.memory_space<smem>>
      %75 = vector.broadcast %74 : f32 to vector<24x128xf32>
      %76 = arith.mulf %73, %75 : vector<24x128xf32>
      %77 = arith.addf %72, %76 : vector<24x128xf32>
      %c126_i32_22 = arith.constant 126 : i32
      %78 = tpu.dynamic_rotate %53 by %c126_i32_22 dim 1 : vector<24x128xf32>, i32 -> vector<24x128xf32>
      %c12 = arith.constant 12 : index
      %79 = memref.load %arg3[%c12] : memref<98xf32, #tpu.memory_space<smem>>
      %80 = vector.broadcast %79 : f32 to vector<24x128xf32>
      %81 = arith.mulf %78, %80 : vector<24x128xf32>
      %82 = arith.addf %77, %81 : vector<24x128xf32>
      %c125_i32_23 = arith.constant 125 : i32
      %83 = tpu.dynamic_rotate %53 by %c125_i32_23 dim 1 : vector<24x128xf32>, i32 -> vector<24x128xf32>
      %c13 = arith.constant 13 : index
      %84 = memref.load %arg3[%c13] : memref<98xf32, #tpu.memory_space<smem>>
      %85 = vector.broadcast %84 : f32 to vector<24x128xf32>
      %86 = arith.mulf %83, %85 : vector<24x128xf32>
      %87 = arith.addf %82, %86 : vector<24x128xf32>
      %c1_i32_24 = arith.constant 1 : i32
      %88 = tpu.dynamic_rotate %13 by %c1_i32_24 dim 0 : vector<24x128xf32>, i32 -> vector<24x128xf32>
      %c3_i32_25 = arith.constant 3 : i32
      %89 = tpu.dynamic_rotate %88 by %c3_i32_25 dim 1 : vector<24x128xf32>, i32 -> vector<24x128xf32>
      %c14 = arith.constant 14 : index
      %90 = memref.load %arg3[%c14] : memref<98xf32, #tpu.memory_space<smem>>
      %91 = vector.broadcast %90 : f32 to vector<24x128xf32>
      %92 = arith.mulf %89, %91 : vector<24x128xf32>
      %93 = arith.addf %87, %92 : vector<24x128xf32>
      %c2_i32_26 = arith.constant 2 : i32
      %94 = tpu.dynamic_rotate %88 by %c2_i32_26 dim 1 : vector<24x128xf32>, i32 -> vector<24x128xf32>
      %c15 = arith.constant 15 : index
      %95 = memref.load %arg3[%c15] : memref<98xf32, #tpu.memory_space<smem>>
      %96 = vector.broadcast %95 : f32 to vector<24x128xf32>
      %97 = arith.mulf %94, %96 : vector<24x128xf32>
      %98 = arith.addf %93, %97 : vector<24x128xf32>
      %c1_i32_27 = arith.constant 1 : i32
      %99 = tpu.dynamic_rotate %88 by %c1_i32_27 dim 1 : vector<24x128xf32>, i32 -> vector<24x128xf32>
      %c16 = arith.constant 16 : index
      %100 = memref.load %arg3[%c16] : memref<98xf32, #tpu.memory_space<smem>>
      %101 = vector.broadcast %100 : f32 to vector<24x128xf32>
      %102 = arith.mulf %99, %101 : vector<24x128xf32>
      %103 = arith.addf %98, %102 : vector<24x128xf32>
      %c17 = arith.constant 17 : index
      %104 = memref.load %arg3[%c17] : memref<98xf32, #tpu.memory_space<smem>>
      %105 = vector.broadcast %104 : f32 to vector<24x128xf32>
      %106 = arith.mulf %88, %105 : vector<24x128xf32>
      %107 = arith.addf %103, %106 : vector<24x128xf32>
      %c127_i32_28 = arith.constant 127 : i32
      %108 = tpu.dynamic_rotate %88 by %c127_i32_28 dim 1 : vector<24x128xf32>, i32 -> vector<24x128xf32>
      %c18 = arith.constant 18 : index
      %109 = memref.load %arg3[%c18] : memref<98xf32, #tpu.memory_space<smem>>
      %110 = vector.broadcast %109 : f32 to vector<24x128xf32>
      %111 = arith.mulf %108, %110 : vector<24x128xf32>
      %112 = arith.addf %107, %111 : vector<24x128xf32>
      %c126_i32_29 = arith.constant 126 : i32
      %113 = tpu.dynamic_rotate %88 by %c126_i32_29 dim 1 : vector<24x128xf32>, i32 -> vector<24x128xf32>
      %c19 = arith.constant 19 : index
      %114 = memref.load %arg3[%c19] : memref<98xf32, #tpu.memory_space<smem>>
      %115 = vector.broadcast %114 : f32 to vector<24x128xf32>
      %116 = arith.mulf %113, %115 : vector<24x128xf32>
      %117 = arith.addf %112, %116 : vector<24x128xf32>
      %c125_i32_30 = arith.constant 125 : i32
      %118 = tpu.dynamic_rotate %88 by %c125_i32_30 dim 1 : vector<24x128xf32>, i32 -> vector<24x128xf32>
      %c20 = arith.constant 20 : index
      %119 = memref.load %arg3[%c20] : memref<98xf32, #tpu.memory_space<smem>>
      %120 = vector.broadcast %119 : f32 to vector<24x128xf32>
      %121 = arith.mulf %118, %120 : vector<24x128xf32>
      %122 = arith.addf %117, %121 : vector<24x128xf32>
      %c3_i32_31 = arith.constant 3 : i32
      %123 = tpu.dynamic_rotate %13 by %c3_i32_31 dim 1 : vector<24x128xf32>, i32 -> vector<24x128xf32>
      %c21 = arith.constant 21 : index
      %124 = memref.load %arg3[%c21] : memref<98xf32, #tpu.memory_space<smem>>
      %125 = vector.broadcast %124 : f32 to vector<24x128xf32>
      %126 = arith.mulf %123, %125 : vector<24x128xf32>
      %127 = arith.addf %122, %126 : vector<24x128xf32>
      %c2_i32_32 = arith.constant 2 : i32
      %128 = tpu.dynamic_rotate %13 by %c2_i32_32 dim 1 : vector<24x128xf32>, i32 -> vector<24x128xf32>
      %c22 = arith.constant 22 : index
      %129 = memref.load %arg3[%c22] : memref<98xf32, #tpu.memory_space<smem>>
      %130 = vector.broadcast %129 : f32 to vector<24x128xf32>
      %131 = arith.mulf %128, %130 : vector<24x128xf32>
      %132 = arith.addf %127, %131 : vector<24x128xf32>
      %c1_i32_33 = arith.constant 1 : i32
      %133 = tpu.dynamic_rotate %13 by %c1_i32_33 dim 1 : vector<24x128xf32>, i32 -> vector<24x128xf32>
      %c23 = arith.constant 23 : index
      %134 = memref.load %arg3[%c23] : memref<98xf32, #tpu.memory_space<smem>>
      %135 = vector.broadcast %134 : f32 to vector<24x128xf32>
      %136 = arith.mulf %133, %135 : vector<24x128xf32>
      %137 = arith.addf %132, %136 : vector<24x128xf32>
      %c24 = arith.constant 24 : index
      %138 = memref.load %arg3[%c24] : memref<98xf32, #tpu.memory_space<smem>>
      %139 = vector.broadcast %138 : f32 to vector<24x128xf32>
      %140 = arith.mulf %13, %139 : vector<24x128xf32>
      %141 = arith.addf %137, %140 : vector<24x128xf32>
      %c127_i32_34 = arith.constant 127 : i32
      %142 = tpu.dynamic_rotate %13 by %c127_i32_34 dim 1 : vector<24x128xf32>, i32 -> vector<24x128xf32>
      %c25 = arith.constant 25 : index
      %143 = memref.load %arg3[%c25] : memref<98xf32, #tpu.memory_space<smem>>
      %144 = vector.broadcast %143 : f32 to vector<24x128xf32>
      %145 = arith.mulf %142, %144 : vector<24x128xf32>
      %146 = arith.addf %141, %145 : vector<24x128xf32>
      %c126_i32_35 = arith.constant 126 : i32
      %147 = tpu.dynamic_rotate %13 by %c126_i32_35 dim 1 : vector<24x128xf32>, i32 -> vector<24x128xf32>
      %c26 = arith.constant 26 : index
      %148 = memref.load %arg3[%c26] : memref<98xf32, #tpu.memory_space<smem>>
      %149 = vector.broadcast %148 : f32 to vector<24x128xf32>
      %150 = arith.mulf %147, %149 : vector<24x128xf32>
      %151 = arith.addf %146, %150 : vector<24x128xf32>
      %c125_i32_36 = arith.constant 125 : i32
      %152 = tpu.dynamic_rotate %13 by %c125_i32_36 dim 1 : vector<24x128xf32>, i32 -> vector<24x128xf32>
      %c27 = arith.constant 27 : index
      %153 = memref.load %arg3[%c27] : memref<98xf32, #tpu.memory_space<smem>>
      %154 = vector.broadcast %153 : f32 to vector<24x128xf32>
      %155 = arith.mulf %152, %154 : vector<24x128xf32>
      %156 = arith.addf %151, %155 : vector<24x128xf32>
      %c23_i32 = arith.constant 23 : i32
      %157 = tpu.dynamic_rotate %13 by %c23_i32 dim 0 : vector<24x128xf32>, i32 -> vector<24x128xf32>
      %c3_i32_37 = arith.constant 3 : i32
      %158 = tpu.dynamic_rotate %157 by %c3_i32_37 dim 1 : vector<24x128xf32>, i32 -> vector<24x128xf32>
      %c28 = arith.constant 28 : index
      %159 = memref.load %arg3[%c28] : memref<98xf32, #tpu.memory_space<smem>>
      %160 = vector.broadcast %159 : f32 to vector<24x128xf32>
      %161 = arith.mulf %158, %160 : vector<24x128xf32>
      %162 = arith.addf %156, %161 : vector<24x128xf32>
      %c2_i32_38 = arith.constant 2 : i32
      %163 = tpu.dynamic_rotate %157 by %c2_i32_38 dim 1 : vector<24x128xf32>, i32 -> vector<24x128xf32>
      %c29 = arith.constant 29 : index
      %164 = memref.load %arg3[%c29] : memref<98xf32, #tpu.memory_space<smem>>
      %165 = vector.broadcast %164 : f32 to vector<24x128xf32>
      %166 = arith.mulf %163, %165 : vector<24x128xf32>
      %167 = arith.addf %162, %166 : vector<24x128xf32>
      %c1_i32_39 = arith.constant 1 : i32
      %168 = tpu.dynamic_rotate %157 by %c1_i32_39 dim 1 : vector<24x128xf32>, i32 -> vector<24x128xf32>
      %c30 = arith.constant 30 : index
      %169 = memref.load %arg3[%c30] : memref<98xf32, #tpu.memory_space<smem>>
      %170 = vector.broadcast %169 : f32 to vector<24x128xf32>
      %171 = arith.mulf %168, %170 : vector<24x128xf32>
      %172 = arith.addf %167, %171 : vector<24x128xf32>
      %c31 = arith.constant 31 : index
      %173 = memref.load %arg3[%c31] : memref<98xf32, #tpu.memory_space<smem>>
      %174 = vector.broadcast %173 : f32 to vector<24x128xf32>
      %175 = arith.mulf %157, %174 : vector<24x128xf32>
      %176 = arith.addf %172, %175 : vector<24x128xf32>
      %c127_i32_40 = arith.constant 127 : i32
      %177 = tpu.dynamic_rotate %157 by %c127_i32_40 dim 1 : vector<24x128xf32>, i32 -> vector<24x128xf32>
      %c32 = arith.constant 32 : index
      %178 = memref.load %arg3[%c32] : memref<98xf32, #tpu.memory_space<smem>>
      %179 = vector.broadcast %178 : f32 to vector<24x128xf32>
      %180 = arith.mulf %177, %179 : vector<24x128xf32>
      %181 = arith.addf %176, %180 : vector<24x128xf32>
      %c126_i32_41 = arith.constant 126 : i32
      %182 = tpu.dynamic_rotate %157 by %c126_i32_41 dim 1 : vector<24x128xf32>, i32 -> vector<24x128xf32>
      %c33 = arith.constant 33 : index
      %183 = memref.load %arg3[%c33] : memref<98xf32, #tpu.memory_space<smem>>
      %184 = vector.broadcast %183 : f32 to vector<24x128xf32>
      %185 = arith.mulf %182, %184 : vector<24x128xf32>
      %186 = arith.addf %181, %185 : vector<24x128xf32>
      %c125_i32_42 = arith.constant 125 : i32
      %187 = tpu.dynamic_rotate %157 by %c125_i32_42 dim 1 : vector<24x128xf32>, i32 -> vector<24x128xf32>
      %c34 = arith.constant 34 : index
      %188 = memref.load %arg3[%c34] : memref<98xf32, #tpu.memory_space<smem>>
      %189 = vector.broadcast %188 : f32 to vector<24x128xf32>
      %190 = arith.mulf %187, %189 : vector<24x128xf32>
      %191 = arith.addf %186, %190 : vector<24x128xf32>
      %c22_i32 = arith.constant 22 : i32
      %192 = tpu.dynamic_rotate %13 by %c22_i32 dim 0 : vector<24x128xf32>, i32 -> vector<24x128xf32>
      %c3_i32_43 = arith.constant 3 : i32
      %193 = tpu.dynamic_rotate %192 by %c3_i32_43 dim 1 : vector<24x128xf32>, i32 -> vector<24x128xf32>
      %c35 = arith.constant 35 : index
      %194 = memref.load %arg3[%c35] : memref<98xf32, #tpu.memory_space<smem>>
      %195 = vector.broadcast %194 : f32 to vector<24x128xf32>
      %196 = arith.mulf %193, %195 : vector<24x128xf32>
      %197 = arith.addf %191, %196 : vector<24x128xf32>
      %c2_i32_44 = arith.constant 2 : i32
      %198 = tpu.dynamic_rotate %192 by %c2_i32_44 dim 1 : vector<24x128xf32>, i32 -> vector<24x128xf32>
      %c36 = arith.constant 36 : index
      %199 = memref.load %arg3[%c36] : memref<98xf32, #tpu.memory_space<smem>>
      %200 = vector.broadcast %199 : f32 to vector<24x128xf32>
      %201 = arith.mulf %198, %200 : vector<24x128xf32>
      %202 = arith.addf %197, %201 : vector<24x128xf32>
      %c1_i32_45 = arith.constant 1 : i32
      %203 = tpu.dynamic_rotate %192 by %c1_i32_45 dim 1 : vector<24x128xf32>, i32 -> vector<24x128xf32>
      %c37 = arith.constant 37 : index
      %204 = memref.load %arg3[%c37] : memref<98xf32, #tpu.memory_space<smem>>
      %205 = vector.broadcast %204 : f32 to vector<24x128xf32>
      %206 = arith.mulf %203, %205 : vector<24x128xf32>
      %207 = arith.addf %202, %206 : vector<24x128xf32>
      %c38 = arith.constant 38 : index
      %208 = memref.load %arg3[%c38] : memref<98xf32, #tpu.memory_space<smem>>
      %209 = vector.broadcast %208 : f32 to vector<24x128xf32>
      %210 = arith.mulf %192, %209 : vector<24x128xf32>
      %211 = arith.addf %207, %210 : vector<24x128xf32>
      %c127_i32_46 = arith.constant 127 : i32
      %212 = tpu.dynamic_rotate %192 by %c127_i32_46 dim 1 : vector<24x128xf32>, i32 -> vector<24x128xf32>
      %c39 = arith.constant 39 : index
      %213 = memref.load %arg3[%c39] : memref<98xf32, #tpu.memory_space<smem>>
      %214 = vector.broadcast %213 : f32 to vector<24x128xf32>
      %215 = arith.mulf %212, %214 : vector<24x128xf32>
      %216 = arith.addf %211, %215 : vector<24x128xf32>
      %c126_i32_47 = arith.constant 126 : i32
      %217 = tpu.dynamic_rotate %192 by %c126_i32_47 dim 1 : vector<24x128xf32>, i32 -> vector<24x128xf32>
      %c40 = arith.constant 40 : index
      %218 = memref.load %arg3[%c40] : memref<98xf32, #tpu.memory_space<smem>>
      %219 = vector.broadcast %218 : f32 to vector<24x128xf32>
      %220 = arith.mulf %217, %219 : vector<24x128xf32>
      %221 = arith.addf %216, %220 : vector<24x128xf32>
      %c125_i32_48 = arith.constant 125 : i32
      %222 = tpu.dynamic_rotate %192 by %c125_i32_48 dim 1 : vector<24x128xf32>, i32 -> vector<24x128xf32>
      %c41 = arith.constant 41 : index
      %223 = memref.load %arg3[%c41] : memref<98xf32, #tpu.memory_space<smem>>
      %224 = vector.broadcast %223 : f32 to vector<24x128xf32>
      %225 = arith.mulf %222, %224 : vector<24x128xf32>
      %226 = arith.addf %221, %225 : vector<24x128xf32>
      %c21_i32 = arith.constant 21 : i32
      %227 = tpu.dynamic_rotate %13 by %c21_i32 dim 0 : vector<24x128xf32>, i32 -> vector<24x128xf32>
      %c3_i32_49 = arith.constant 3 : i32
      %228 = tpu.dynamic_rotate %227 by %c3_i32_49 dim 1 : vector<24x128xf32>, i32 -> vector<24x128xf32>
      %c42 = arith.constant 42 : index
      %229 = memref.load %arg3[%c42] : memref<98xf32, #tpu.memory_space<smem>>
      %230 = vector.broadcast %229 : f32 to vector<24x128xf32>
      %231 = arith.mulf %228, %230 : vector<24x128xf32>
      %232 = arith.addf %226, %231 : vector<24x128xf32>
      %c2_i32_50 = arith.constant 2 : i32
      %233 = tpu.dynamic_rotate %227 by %c2_i32_50 dim 1 : vector<24x128xf32>, i32 -> vector<24x128xf32>
      %c43 = arith.constant 43 : index
      %234 = memref.load %arg3[%c43] : memref<98xf32, #tpu.memory_space<smem>>
      %235 = vector.broadcast %234 : f32 to vector<24x128xf32>
      %236 = arith.mulf %233, %235 : vector<24x128xf32>
      %237 = arith.addf %232, %236 : vector<24x128xf32>
      %c1_i32_51 = arith.constant 1 : i32
      %238 = tpu.dynamic_rotate %227 by %c1_i32_51 dim 1 : vector<24x128xf32>, i32 -> vector<24x128xf32>
      %c44 = arith.constant 44 : index
      %239 = memref.load %arg3[%c44] : memref<98xf32, #tpu.memory_space<smem>>
      %240 = vector.broadcast %239 : f32 to vector<24x128xf32>
      %241 = arith.mulf %238, %240 : vector<24x128xf32>
      %242 = arith.addf %237, %241 : vector<24x128xf32>
      %c45 = arith.constant 45 : index
      %243 = memref.load %arg3[%c45] : memref<98xf32, #tpu.memory_space<smem>>
      %244 = vector.broadcast %243 : f32 to vector<24x128xf32>
      %245 = arith.mulf %227, %244 : vector<24x128xf32>
      %246 = arith.addf %242, %245 : vector<24x128xf32>
      %c127_i32_52 = arith.constant 127 : i32
      %247 = tpu.dynamic_rotate %227 by %c127_i32_52 dim 1 : vector<24x128xf32>, i32 -> vector<24x128xf32>
      %c46 = arith.constant 46 : index
      %248 = memref.load %arg3[%c46] : memref<98xf32, #tpu.memory_space<smem>>
      %249 = vector.broadcast %248 : f32 to vector<24x128xf32>
      %250 = arith.mulf %247, %249 : vector<24x128xf32>
      %251 = arith.addf %246, %250 : vector<24x128xf32>
      %c126_i32_53 = arith.constant 126 : i32
      %252 = tpu.dynamic_rotate %227 by %c126_i32_53 dim 1 : vector<24x128xf32>, i32 -> vector<24x128xf32>
      %c47 = arith.constant 47 : index
      %253 = memref.load %arg3[%c47] : memref<98xf32, #tpu.memory_space<smem>>
      %254 = vector.broadcast %253 : f32 to vector<24x128xf32>
      %255 = arith.mulf %252, %254 : vector<24x128xf32>
      %256 = arith.addf %251, %255 : vector<24x128xf32>
      %c125_i32_54 = arith.constant 125 : i32
      %257 = tpu.dynamic_rotate %227 by %c125_i32_54 dim 1 : vector<24x128xf32>, i32 -> vector<24x128xf32>
      %c48 = arith.constant 48 : index
      %258 = memref.load %arg3[%c48] : memref<98xf32, #tpu.memory_space<smem>>
      %259 = vector.broadcast %258 : f32 to vector<24x128xf32>
      %260 = arith.mulf %257, %259 : vector<24x128xf32>
      %261 = arith.addf %256, %260 : vector<24x128xf32>
      %c3_i32_55 = arith.constant 3 : i32
      %262 = tpu.dynamic_rotate %16 by %c3_i32_55 dim 0 : vector<24x128xf32>, i32 -> vector<24x128xf32>
      %c3_i32_56 = arith.constant 3 : i32
      %263 = tpu.dynamic_rotate %262 by %c3_i32_56 dim 1 : vector<24x128xf32>, i32 -> vector<24x128xf32>
      %c49 = arith.constant 49 : index
      %264 = memref.load %arg3[%c49] : memref<98xf32, #tpu.memory_space<smem>>
      %265 = vector.broadcast %264 : f32 to vector<24x128xf32>
      %266 = arith.mulf %263, %265 : vector<24x128xf32>
      %267 = arith.addf %261, %266 : vector<24x128xf32>
      %c2_i32_57 = arith.constant 2 : i32
      %268 = tpu.dynamic_rotate %262 by %c2_i32_57 dim 1 : vector<24x128xf32>, i32 -> vector<24x128xf32>
      %c50 = arith.constant 50 : index
      %269 = memref.load %arg3[%c50] : memref<98xf32, #tpu.memory_space<smem>>
      %270 = vector.broadcast %269 : f32 to vector<24x128xf32>
      %271 = arith.mulf %268, %270 : vector<24x128xf32>
      %272 = arith.addf %267, %271 : vector<24x128xf32>
      %c1_i32_58 = arith.constant 1 : i32
      %273 = tpu.dynamic_rotate %262 by %c1_i32_58 dim 1 : vector<24x128xf32>, i32 -> vector<24x128xf32>
      %c51 = arith.constant 51 : index
      %274 = memref.load %arg3[%c51] : memref<98xf32, #tpu.memory_space<smem>>
      %275 = vector.broadcast %274 : f32 to vector<24x128xf32>
      %276 = arith.mulf %273, %275 : vector<24x128xf32>
      %277 = arith.addf %272, %276 : vector<24x128xf32>
      %c52 = arith.constant 52 : index
      %278 = memref.load %arg3[%c52] : memref<98xf32, #tpu.memory_space<smem>>
      %279 = vector.broadcast %278 : f32 to vector<24x128xf32>
      %280 = arith.mulf %262, %279 : vector<24x128xf32>
      %281 = arith.addf %277, %280 : vector<24x128xf32>
      %c127_i32_59 = arith.constant 127 : i32
      %282 = tpu.dynamic_rotate %262 by %c127_i32_59 dim 1 : vector<24x128xf32>, i32 -> vector<24x128xf32>
      %c53 = arith.constant 53 : index
      %283 = memref.load %arg3[%c53] : memref<98xf32, #tpu.memory_space<smem>>
      %284 = vector.broadcast %283 : f32 to vector<24x128xf32>
      %285 = arith.mulf %282, %284 : vector<24x128xf32>
      %286 = arith.addf %281, %285 : vector<24x128xf32>
      %c126_i32_60 = arith.constant 126 : i32
      %287 = tpu.dynamic_rotate %262 by %c126_i32_60 dim 1 : vector<24x128xf32>, i32 -> vector<24x128xf32>
      %c54 = arith.constant 54 : index
      %288 = memref.load %arg3[%c54] : memref<98xf32, #tpu.memory_space<smem>>
      %289 = vector.broadcast %288 : f32 to vector<24x128xf32>
      %290 = arith.mulf %287, %289 : vector<24x128xf32>
      %291 = arith.addf %286, %290 : vector<24x128xf32>
      %c125_i32_61 = arith.constant 125 : i32
      %292 = tpu.dynamic_rotate %262 by %c125_i32_61 dim 1 : vector<24x128xf32>, i32 -> vector<24x128xf32>
      %c55 = arith.constant 55 : index
      %293 = memref.load %arg3[%c55] : memref<98xf32, #tpu.memory_space<smem>>
      %294 = vector.broadcast %293 : f32 to vector<24x128xf32>
      %295 = arith.mulf %292, %294 : vector<24x128xf32>
      %296 = arith.addf %291, %295 : vector<24x128xf32>
      %c2_i32_62 = arith.constant 2 : i32
      %297 = tpu.dynamic_rotate %16 by %c2_i32_62 dim 0 : vector<24x128xf32>, i32 -> vector<24x128xf32>
      %c3_i32_63 = arith.constant 3 : i32
      %298 = tpu.dynamic_rotate %297 by %c3_i32_63 dim 1 : vector<24x128xf32>, i32 -> vector<24x128xf32>
      %c56 = arith.constant 56 : index
      %299 = memref.load %arg3[%c56] : memref<98xf32, #tpu.memory_space<smem>>
      %300 = vector.broadcast %299 : f32 to vector<24x128xf32>
      %301 = arith.mulf %298, %300 : vector<24x128xf32>
      %302 = arith.addf %296, %301 : vector<24x128xf32>
      %c2_i32_64 = arith.constant 2 : i32
      %303 = tpu.dynamic_rotate %297 by %c2_i32_64 dim 1 : vector<24x128xf32>, i32 -> vector<24x128xf32>
      %c57 = arith.constant 57 : index
      %304 = memref.load %arg3[%c57] : memref<98xf32, #tpu.memory_space<smem>>
      %305 = vector.broadcast %304 : f32 to vector<24x128xf32>
      %306 = arith.mulf %303, %305 : vector<24x128xf32>
      %307 = arith.addf %302, %306 : vector<24x128xf32>
      %c1_i32_65 = arith.constant 1 : i32
      %308 = tpu.dynamic_rotate %297 by %c1_i32_65 dim 1 : vector<24x128xf32>, i32 -> vector<24x128xf32>
      %c58 = arith.constant 58 : index
      %309 = memref.load %arg3[%c58] : memref<98xf32, #tpu.memory_space<smem>>
      %310 = vector.broadcast %309 : f32 to vector<24x128xf32>
      %311 = arith.mulf %308, %310 : vector<24x128xf32>
      %312 = arith.addf %307, %311 : vector<24x128xf32>
      %c59 = arith.constant 59 : index
      %313 = memref.load %arg3[%c59] : memref<98xf32, #tpu.memory_space<smem>>
      %314 = vector.broadcast %313 : f32 to vector<24x128xf32>
      %315 = arith.mulf %297, %314 : vector<24x128xf32>
      %316 = arith.addf %312, %315 : vector<24x128xf32>
      %c127_i32_66 = arith.constant 127 : i32
      %317 = tpu.dynamic_rotate %297 by %c127_i32_66 dim 1 : vector<24x128xf32>, i32 -> vector<24x128xf32>
      %c60 = arith.constant 60 : index
      %318 = memref.load %arg3[%c60] : memref<98xf32, #tpu.memory_space<smem>>
      %319 = vector.broadcast %318 : f32 to vector<24x128xf32>
      %320 = arith.mulf %317, %319 : vector<24x128xf32>
      %321 = arith.addf %316, %320 : vector<24x128xf32>
      %c126_i32_67 = arith.constant 126 : i32
      %322 = tpu.dynamic_rotate %297 by %c126_i32_67 dim 1 : vector<24x128xf32>, i32 -> vector<24x128xf32>
      %c61 = arith.constant 61 : index
      %323 = memref.load %arg3[%c61] : memref<98xf32, #tpu.memory_space<smem>>
      %324 = vector.broadcast %323 : f32 to vector<24x128xf32>
      %325 = arith.mulf %322, %324 : vector<24x128xf32>
      %326 = arith.addf %321, %325 : vector<24x128xf32>
      %c125_i32_68 = arith.constant 125 : i32
      %327 = tpu.dynamic_rotate %297 by %c125_i32_68 dim 1 : vector<24x128xf32>, i32 -> vector<24x128xf32>
      %c62 = arith.constant 62 : index
      %328 = memref.load %arg3[%c62] : memref<98xf32, #tpu.memory_space<smem>>
      %329 = vector.broadcast %328 : f32 to vector<24x128xf32>
      %330 = arith.mulf %327, %329 : vector<24x128xf32>
      %331 = arith.addf %326, %330 : vector<24x128xf32>
      %c1_i32_69 = arith.constant 1 : i32
      %332 = tpu.dynamic_rotate %16 by %c1_i32_69 dim 0 : vector<24x128xf32>, i32 -> vector<24x128xf32>
      %c3_i32_70 = arith.constant 3 : i32
      %333 = tpu.dynamic_rotate %332 by %c3_i32_70 dim 1 : vector<24x128xf32>, i32 -> vector<24x128xf32>
      %c63 = arith.constant 63 : index
      %334 = memref.load %arg3[%c63] : memref<98xf32, #tpu.memory_space<smem>>
      %335 = vector.broadcast %334 : f32 to vector<24x128xf32>
      %336 = arith.mulf %333, %335 : vector<24x128xf32>
      %337 = arith.addf %331, %336 : vector<24x128xf32>
      %c2_i32_71 = arith.constant 2 : i32
      %338 = tpu.dynamic_rotate %332 by %c2_i32_71 dim 1 : vector<24x128xf32>, i32 -> vector<24x128xf32>
      %c64 = arith.constant 64 : index
      %339 = memref.load %arg3[%c64] : memref<98xf32, #tpu.memory_space<smem>>
      %340 = vector.broadcast %339 : f32 to vector<24x128xf32>
      %341 = arith.mulf %338, %340 : vector<24x128xf32>
      %342 = arith.addf %337, %341 : vector<24x128xf32>
      %c1_i32_72 = arith.constant 1 : i32
      %343 = tpu.dynamic_rotate %332 by %c1_i32_72 dim 1 : vector<24x128xf32>, i32 -> vector<24x128xf32>
      %c65 = arith.constant 65 : index
      %344 = memref.load %arg3[%c65] : memref<98xf32, #tpu.memory_space<smem>>
      %345 = vector.broadcast %344 : f32 to vector<24x128xf32>
      %346 = arith.mulf %343, %345 : vector<24x128xf32>
      %347 = arith.addf %342, %346 : vector<24x128xf32>
      %c66 = arith.constant 66 : index
      %348 = memref.load %arg3[%c66] : memref<98xf32, #tpu.memory_space<smem>>
      %349 = vector.broadcast %348 : f32 to vector<24x128xf32>
      %350 = arith.mulf %332, %349 : vector<24x128xf32>
      %351 = arith.addf %347, %350 : vector<24x128xf32>
      %c127_i32_73 = arith.constant 127 : i32
      %352 = tpu.dynamic_rotate %332 by %c127_i32_73 dim 1 : vector<24x128xf32>, i32 -> vector<24x128xf32>
      %c67 = arith.constant 67 : index
      %353 = memref.load %arg3[%c67] : memref<98xf32, #tpu.memory_space<smem>>
      %354 = vector.broadcast %353 : f32 to vector<24x128xf32>
      %355 = arith.mulf %352, %354 : vector<24x128xf32>
      %356 = arith.addf %351, %355 : vector<24x128xf32>
      %c126_i32_74 = arith.constant 126 : i32
      %357 = tpu.dynamic_rotate %332 by %c126_i32_74 dim 1 : vector<24x128xf32>, i32 -> vector<24x128xf32>
      %c68 = arith.constant 68 : index
      %358 = memref.load %arg3[%c68] : memref<98xf32, #tpu.memory_space<smem>>
      %359 = vector.broadcast %358 : f32 to vector<24x128xf32>
      %360 = arith.mulf %357, %359 : vector<24x128xf32>
      %361 = arith.addf %356, %360 : vector<24x128xf32>
      %c125_i32_75 = arith.constant 125 : i32
      %362 = tpu.dynamic_rotate %332 by %c125_i32_75 dim 1 : vector<24x128xf32>, i32 -> vector<24x128xf32>
      %c69 = arith.constant 69 : index
      %363 = memref.load %arg3[%c69] : memref<98xf32, #tpu.memory_space<smem>>
      %364 = vector.broadcast %363 : f32 to vector<24x128xf32>
      %365 = arith.mulf %362, %364 : vector<24x128xf32>
      %366 = arith.addf %361, %365 : vector<24x128xf32>
      %c3_i32_76 = arith.constant 3 : i32
      %367 = tpu.dynamic_rotate %16 by %c3_i32_76 dim 1 : vector<24x128xf32>, i32 -> vector<24x128xf32>
      %c70 = arith.constant 70 : index
      %368 = memref.load %arg3[%c70] : memref<98xf32, #tpu.memory_space<smem>>
      %369 = vector.broadcast %368 : f32 to vector<24x128xf32>
      %370 = arith.mulf %367, %369 : vector<24x128xf32>
      %371 = arith.addf %366, %370 : vector<24x128xf32>
      %c2_i32_77 = arith.constant 2 : i32
      %372 = tpu.dynamic_rotate %16 by %c2_i32_77 dim 1 : vector<24x128xf32>, i32 -> vector<24x128xf32>
      %c71 = arith.constant 71 : index
      %373 = memref.load %arg3[%c71] : memref<98xf32, #tpu.memory_space<smem>>
      %374 = vector.broadcast %373 : f32 to vector<24x128xf32>
      %375 = arith.mulf %372, %374 : vector<24x128xf32>
      %376 = arith.addf %371, %375 : vector<24x128xf32>
      %c1_i32_78 = arith.constant 1 : i32
      %377 = tpu.dynamic_rotate %16 by %c1_i32_78 dim 1 : vector<24x128xf32>, i32 -> vector<24x128xf32>
      %c72 = arith.constant 72 : index
      %378 = memref.load %arg3[%c72] : memref<98xf32, #tpu.memory_space<smem>>
      %379 = vector.broadcast %378 : f32 to vector<24x128xf32>
      %380 = arith.mulf %377, %379 : vector<24x128xf32>
      %381 = arith.addf %376, %380 : vector<24x128xf32>
      %c73 = arith.constant 73 : index
      %382 = memref.load %arg3[%c73] : memref<98xf32, #tpu.memory_space<smem>>
      %383 = vector.broadcast %382 : f32 to vector<24x128xf32>
      %384 = arith.mulf %16, %383 : vector<24x128xf32>
      %385 = arith.addf %381, %384 : vector<24x128xf32>
      %c127_i32_79 = arith.constant 127 : i32
      %386 = tpu.dynamic_rotate %16 by %c127_i32_79 dim 1 : vector<24x128xf32>, i32 -> vector<24x128xf32>
      %c74 = arith.constant 74 : index
      %387 = memref.load %arg3[%c74] : memref<98xf32, #tpu.memory_space<smem>>
      %388 = vector.broadcast %387 : f32 to vector<24x128xf32>
      %389 = arith.mulf %386, %388 : vector<24x128xf32>
      %390 = arith.addf %385, %389 : vector<24x128xf32>
      %c126_i32_80 = arith.constant 126 : i32
      %391 = tpu.dynamic_rotate %16 by %c126_i32_80 dim 1 : vector<24x128xf32>, i32 -> vector<24x128xf32>
      %c75 = arith.constant 75 : index
      %392 = memref.load %arg3[%c75] : memref<98xf32, #tpu.memory_space<smem>>
      %393 = vector.broadcast %392 : f32 to vector<24x128xf32>
      %394 = arith.mulf %391, %393 : vector<24x128xf32>
      %395 = arith.addf %390, %394 : vector<24x128xf32>
      %c125_i32_81 = arith.constant 125 : i32
      %396 = tpu.dynamic_rotate %16 by %c125_i32_81 dim 1 : vector<24x128xf32>, i32 -> vector<24x128xf32>
      %c76 = arith.constant 76 : index
      %397 = memref.load %arg3[%c76] : memref<98xf32, #tpu.memory_space<smem>>
      %398 = vector.broadcast %397 : f32 to vector<24x128xf32>
      %399 = arith.mulf %396, %398 : vector<24x128xf32>
      %400 = arith.addf %395, %399 : vector<24x128xf32>
      %c23_i32_82 = arith.constant 23 : i32
      %401 = tpu.dynamic_rotate %16 by %c23_i32_82 dim 0 : vector<24x128xf32>, i32 -> vector<24x128xf32>
      %c3_i32_83 = arith.constant 3 : i32
      %402 = tpu.dynamic_rotate %401 by %c3_i32_83 dim 1 : vector<24x128xf32>, i32 -> vector<24x128xf32>
      %c77 = arith.constant 77 : index
      %403 = memref.load %arg3[%c77] : memref<98xf32, #tpu.memory_space<smem>>
      %404 = vector.broadcast %403 : f32 to vector<24x128xf32>
      %405 = arith.mulf %402, %404 : vector<24x128xf32>
      %406 = arith.addf %400, %405 : vector<24x128xf32>
      %c2_i32_84 = arith.constant 2 : i32
      %407 = tpu.dynamic_rotate %401 by %c2_i32_84 dim 1 : vector<24x128xf32>, i32 -> vector<24x128xf32>
      %c78 = arith.constant 78 : index
      %408 = memref.load %arg3[%c78] : memref<98xf32, #tpu.memory_space<smem>>
      %409 = vector.broadcast %408 : f32 to vector<24x128xf32>
      %410 = arith.mulf %407, %409 : vector<24x128xf32>
      %411 = arith.addf %406, %410 : vector<24x128xf32>
      %c1_i32_85 = arith.constant 1 : i32
      %412 = tpu.dynamic_rotate %401 by %c1_i32_85 dim 1 : vector<24x128xf32>, i32 -> vector<24x128xf32>
      %c79 = arith.constant 79 : index
      %413 = memref.load %arg3[%c79] : memref<98xf32, #tpu.memory_space<smem>>
      %414 = vector.broadcast %413 : f32 to vector<24x128xf32>
      %415 = arith.mulf %412, %414 : vector<24x128xf32>
      %416 = arith.addf %411, %415 : vector<24x128xf32>
      %c80 = arith.constant 80 : index
      %417 = memref.load %arg3[%c80] : memref<98xf32, #tpu.memory_space<smem>>
      %418 = vector.broadcast %417 : f32 to vector<24x128xf32>
      %419 = arith.mulf %401, %418 : vector<24x128xf32>
      %420 = arith.addf %416, %419 : vector<24x128xf32>
      %c127_i32_86 = arith.constant 127 : i32
      %421 = tpu.dynamic_rotate %401 by %c127_i32_86 dim 1 : vector<24x128xf32>, i32 -> vector<24x128xf32>
      %c81 = arith.constant 81 : index
      %422 = memref.load %arg3[%c81] : memref<98xf32, #tpu.memory_space<smem>>
      %423 = vector.broadcast %422 : f32 to vector<24x128xf32>
      %424 = arith.mulf %421, %423 : vector<24x128xf32>
      %425 = arith.addf %420, %424 : vector<24x128xf32>
      %c126_i32_87 = arith.constant 126 : i32
      %426 = tpu.dynamic_rotate %401 by %c126_i32_87 dim 1 : vector<24x128xf32>, i32 -> vector<24x128xf32>
      %c82 = arith.constant 82 : index
      %427 = memref.load %arg3[%c82] : memref<98xf32, #tpu.memory_space<smem>>
      %428 = vector.broadcast %427 : f32 to vector<24x128xf32>
      %429 = arith.mulf %426, %428 : vector<24x128xf32>
      %430 = arith.addf %425, %429 : vector<24x128xf32>
      %c125_i32_88 = arith.constant 125 : i32
      %431 = tpu.dynamic_rotate %401 by %c125_i32_88 dim 1 : vector<24x128xf32>, i32 -> vector<24x128xf32>
      %c83 = arith.constant 83 : index
      %432 = memref.load %arg3[%c83] : memref<98xf32, #tpu.memory_space<smem>>
      %433 = vector.broadcast %432 : f32 to vector<24x128xf32>
      %434 = arith.mulf %431, %433 : vector<24x128xf32>
      %435 = arith.addf %430, %434 : vector<24x128xf32>
      %c22_i32_89 = arith.constant 22 : i32
      %436 = tpu.dynamic_rotate %16 by %c22_i32_89 dim 0 : vector<24x128xf32>, i32 -> vector<24x128xf32>
      %c3_i32_90 = arith.constant 3 : i32
      %437 = tpu.dynamic_rotate %436 by %c3_i32_90 dim 1 : vector<24x128xf32>, i32 -> vector<24x128xf32>
      %c84 = arith.constant 84 : index
      %438 = memref.load %arg3[%c84] : memref<98xf32, #tpu.memory_space<smem>>
      %439 = vector.broadcast %438 : f32 to vector<24x128xf32>
      %440 = arith.mulf %437, %439 : vector<24x128xf32>
      %441 = arith.addf %435, %440 : vector<24x128xf32>
      %c2_i32_91 = arith.constant 2 : i32
      %442 = tpu.dynamic_rotate %436 by %c2_i32_91 dim 1 : vector<24x128xf32>, i32 -> vector<24x128xf32>
      %c85 = arith.constant 85 : index
      %443 = memref.load %arg3[%c85] : memref<98xf32, #tpu.memory_space<smem>>
      %444 = vector.broadcast %443 : f32 to vector<24x128xf32>
      %445 = arith.mulf %442, %444 : vector<24x128xf32>
      %446 = arith.addf %441, %445 : vector<24x128xf32>
      %c1_i32_92 = arith.constant 1 : i32
      %447 = tpu.dynamic_rotate %436 by %c1_i32_92 dim 1 : vector<24x128xf32>, i32 -> vector<24x128xf32>
      %c86 = arith.constant 86 : index
      %448 = memref.load %arg3[%c86] : memref<98xf32, #tpu.memory_space<smem>>
      %449 = vector.broadcast %448 : f32 to vector<24x128xf32>
      %450 = arith.mulf %447, %449 : vector<24x128xf32>
      %451 = arith.addf %446, %450 : vector<24x128xf32>
      %c87 = arith.constant 87 : index
      %452 = memref.load %arg3[%c87] : memref<98xf32, #tpu.memory_space<smem>>
      %453 = vector.broadcast %452 : f32 to vector<24x128xf32>
      %454 = arith.mulf %436, %453 : vector<24x128xf32>
      %455 = arith.addf %451, %454 : vector<24x128xf32>
      %c127_i32_93 = arith.constant 127 : i32
      %456 = tpu.dynamic_rotate %436 by %c127_i32_93 dim 1 : vector<24x128xf32>, i32 -> vector<24x128xf32>
      %c88 = arith.constant 88 : index
      %457 = memref.load %arg3[%c88] : memref<98xf32, #tpu.memory_space<smem>>
      %458 = vector.broadcast %457 : f32 to vector<24x128xf32>
      %459 = arith.mulf %456, %458 : vector<24x128xf32>
      %460 = arith.addf %455, %459 : vector<24x128xf32>
      %c126_i32_94 = arith.constant 126 : i32
      %461 = tpu.dynamic_rotate %436 by %c126_i32_94 dim 1 : vector<24x128xf32>, i32 -> vector<24x128xf32>
      %c89 = arith.constant 89 : index
      %462 = memref.load %arg3[%c89] : memref<98xf32, #tpu.memory_space<smem>>
      %463 = vector.broadcast %462 : f32 to vector<24x128xf32>
      %464 = arith.mulf %461, %463 : vector<24x128xf32>
      %465 = arith.addf %460, %464 : vector<24x128xf32>
      %c125_i32_95 = arith.constant 125 : i32
      %466 = tpu.dynamic_rotate %436 by %c125_i32_95 dim 1 : vector<24x128xf32>, i32 -> vector<24x128xf32>
      %c90 = arith.constant 90 : index
      %467 = memref.load %arg3[%c90] : memref<98xf32, #tpu.memory_space<smem>>
      %468 = vector.broadcast %467 : f32 to vector<24x128xf32>
      %469 = arith.mulf %466, %468 : vector<24x128xf32>
      %470 = arith.addf %465, %469 : vector<24x128xf32>
      %c21_i32_96 = arith.constant 21 : i32
      %471 = tpu.dynamic_rotate %16 by %c21_i32_96 dim 0 : vector<24x128xf32>, i32 -> vector<24x128xf32>
      %c3_i32_97 = arith.constant 3 : i32
      %472 = tpu.dynamic_rotate %471 by %c3_i32_97 dim 1 : vector<24x128xf32>, i32 -> vector<24x128xf32>
      %c91 = arith.constant 91 : index
      %473 = memref.load %arg3[%c91] : memref<98xf32, #tpu.memory_space<smem>>
      %474 = vector.broadcast %473 : f32 to vector<24x128xf32>
      %475 = arith.mulf %472, %474 : vector<24x128xf32>
      %476 = arith.addf %470, %475 : vector<24x128xf32>
      %c2_i32_98 = arith.constant 2 : i32
      %477 = tpu.dynamic_rotate %471 by %c2_i32_98 dim 1 : vector<24x128xf32>, i32 -> vector<24x128xf32>
      %c92 = arith.constant 92 : index
      %478 = memref.load %arg3[%c92] : memref<98xf32, #tpu.memory_space<smem>>
      %479 = vector.broadcast %478 : f32 to vector<24x128xf32>
      %480 = arith.mulf %477, %479 : vector<24x128xf32>
      %481 = arith.addf %476, %480 : vector<24x128xf32>
      %c1_i32_99 = arith.constant 1 : i32
      %482 = tpu.dynamic_rotate %471 by %c1_i32_99 dim 1 : vector<24x128xf32>, i32 -> vector<24x128xf32>
      %c93 = arith.constant 93 : index
      %483 = memref.load %arg3[%c93] : memref<98xf32, #tpu.memory_space<smem>>
      %484 = vector.broadcast %483 : f32 to vector<24x128xf32>
      %485 = arith.mulf %482, %484 : vector<24x128xf32>
      %486 = arith.addf %481, %485 : vector<24x128xf32>
      %c94 = arith.constant 94 : index
      %487 = memref.load %arg3[%c94] : memref<98xf32, #tpu.memory_space<smem>>
      %488 = vector.broadcast %487 : f32 to vector<24x128xf32>
      %489 = arith.mulf %471, %488 : vector<24x128xf32>
      %490 = arith.addf %486, %489 : vector<24x128xf32>
      %c127_i32_100 = arith.constant 127 : i32
      %491 = tpu.dynamic_rotate %471 by %c127_i32_100 dim 1 : vector<24x128xf32>, i32 -> vector<24x128xf32>
      %c95 = arith.constant 95 : index
      %492 = memref.load %arg3[%c95] : memref<98xf32, #tpu.memory_space<smem>>
      %493 = vector.broadcast %492 : f32 to vector<24x128xf32>
      %494 = arith.mulf %491, %493 : vector<24x128xf32>
      %495 = arith.addf %490, %494 : vector<24x128xf32>
      %c126_i32_101 = arith.constant 126 : i32
      %496 = tpu.dynamic_rotate %471 by %c126_i32_101 dim 1 : vector<24x128xf32>, i32 -> vector<24x128xf32>
      %c96 = arith.constant 96 : index
      %497 = memref.load %arg3[%c96] : memref<98xf32, #tpu.memory_space<smem>>
      %498 = vector.broadcast %497 : f32 to vector<24x128xf32>
      %499 = arith.mulf %496, %498 : vector<24x128xf32>
      %500 = arith.addf %495, %499 : vector<24x128xf32>
      %c125_i32_102 = arith.constant 125 : i32
      %501 = tpu.dynamic_rotate %471 by %c125_i32_102 dim 1 : vector<24x128xf32>, i32 -> vector<24x128xf32>
      %c97 = arith.constant 97 : index
      %502 = memref.load %arg3[%c97] : memref<98xf32, #tpu.memory_space<smem>>
      %503 = vector.broadcast %502 : f32 to vector<24x128xf32>
      %504 = arith.mulf %501, %503 : vector<24x128xf32>
      %505 = arith.addf %500, %504 : vector<24x128xf32>
      %506 = vector.extract_strided_slice %505 {offsets = [0, 0], sizes = [16, 16], strides = [1, 1]} : vector<24x128xf32> to vector<16x16xf32>
      %cst_103 = arith.constant 0.000000e+00 : f32
      %507 = vector.broadcast %cst_103 : f32 to vector<16x16xf32>
      %508 = arith.subf %507, %506 : vector<16x16xf32>
      %509 = math.exp %508 : vector<16x16xf32>
      %cst_104 = arith.constant 1.000000e+00 : f32
      %510 = vector.broadcast %cst_104 : f32 to vector<16x16xf32>
      %511 = arith.addf %510, %509 : vector<16x16xf32>
      %cst_105 = arith.constant 1.000000e+00 : f32
      %512 = vector.broadcast %cst_105 : f32 to vector<16x16xf32>
      %513 = arith.divf %512, %511 : vector<16x16xf32>
      %c0_106 = arith.constant 0 : index
      %c0_107 = arith.constant 0 : index
      %c0_108 = arith.constant 0 : index
      %c0_109 = arith.constant 0 : index
      %514 = vector.load %arg4[%c0_106, %c0_107, %c0_108, %c0_109] : memref<1x1x16x16xf32, #tpu.memory_space<vmem>>, vector<1x1x16x16xf32>
      %515 = vector.shape_cast %514 : vector<1x1x16x16xf32> to vector<16x16xf32>
      %516 = vector.shape_cast %513 : vector<16x16xf32> to vector<1x1x16x16xf32>
      tpu.vector_store %arg4[%c0_106, %c0_107, %c0_108, %c0_109], %516 {strides = array<i32>} : memref<1x1x16x16xf32, #tpu.memory_space<vmem>>, vector<1x1x16x16xf32>,
    } else {
    }
    return
  }
  func.func @transform_0(%arg0: i32, %arg1: i32) -> (i32, i32, i32, i32) {
    %c0_i32 = arith.constant 0 : i32
    %c0_i32_0 = arith.constant 0 : i32
    %c0_i32_1 = arith.constant 0 : i32
    return %arg0, %arg1, %c0_i32, %c0_i32_0 : i32, i32, i32, i32
  }
  func.func @transform_1(%arg0: i32, %arg1: i32) -> i32 {
    %c0_i32 = arith.constant 0 : i32
    %c0_i32_0 = arith.constant 0 : i32
    return %c0_i32 : i32
  }
  func.func @transform_2(%arg0: i32, %arg1: i32) -> (i32, i32, i32, i32) {
    %c0_i32 = arith.constant 0 : i32
    %c0_i32_0 = arith.constant 0 : i32
    %c0_i32_1 = arith.constant 0 : i32
    %c0_i32_2 = arith.constant 0 : i32
    return %arg0, %c0_i32, %c0_i32_0, %c0_i32_1 : i32, i32, i32, i32
  }
}

</mosaic_0001>

<bundles_post_ra>
// kernel: tpu_custom_call.1
= control target key start
LH: loop header
LB: loop body
LE: loop exit
PB: predicated region body
PF: predicated region fallthrough
CT: control target
= control target key end

     0   :  { %s2756_s0 = inlined_call_operand.hbm [shape: f32[2,4,16,16], index: 0, kind: input, shape index: {}]   ;;  %s2757_s1 = inlined_call_operand.vmem [shape: f32[98], index: 1, kind: input, shape index: {}]   ;;  %s2758_s2 = inlined_call_operand.hbm [shape: f32[2,1,16,16], index: 2, kind: output, shape index: {}]  }
   0x1   :  { %2768 = sst [smem:[#allocation18_spill]] %s2757_s1 }
   0x2   :  { %7 = vsyncpa [#allocation5], 0 }
   0x3   :  { %9 = vsyncpa [#allocation5 + $0x1], 0 }
   0x4   :  { %10 = vsyncpa [#allocation7], 0 }
   0x5   :  { %11 = vsyncpa [#allocation6], 0 }
   0x6   :  { %13 = vsyncpa [#allocation6 + $0x1], 0  ;;  %s1824_s9 = smov 0   ;;  %s1826_s10 = smov 0  }
   0x7   :  { %s1828_s11 = smov 0   ;;  %s1830_s12 = smov 0  }
   0x8   :  { %s1832_s13 = smov 0   ;;  %s1834_s14 = smov 0  }
   0x9   :  { %s1836_s15 = smov 0   ;;  %s1838_s16 = smov 0  }
   0xa   :  { %s1840_s17 = smov 0   ;;  %s1842_s18 = smov 0  }
   0xb   :  { %s1844_s19 = smov 0  }
   0xc LB: > { %2769 = sst [smem:[#allocation13_spill]] %s1753_s9  ;;  %s1373_s20 = sadd.s32 4294967295, %s1793_s19   ;;  %s1793_s19 = sphi %s1844_s19, %s2802_s19   ;;  %s1789_s18 = sphi %s1842_s18, %s2801_s18   ;;  %s1785_s17 = sphi %s1840_s17, %s2792_s17   ;;  %s1781_s16 = sphi %s1838_s16, %s2800_s16   ;;  %s1777_s15 = sphi %s1836_s15, %s2791_s15   ;;  %s1773_s14 = sphi %s1834_s14, %s2799_s14   ;;  %s1769_s13 = sphi %s1832_s13, %s2798_s13   ;;  %s1765_s12 = sphi %s1830_s12, %s2797_s12   ;;  %s1761_s11 = sphi %s1828_s11, %s2796_s11   ;;  %s1757_s10 = sphi %s1826_s10, %s2795_s10   ;;  %s1753_s9 = sphi %s1824_s9, %s2794_s9  }
   0xd   : > { %2770 = sst [smem:[#allocation14_spill]] %s1785_s17  ;;  %s1374_s21 = sadd.s32 4294967294, %s1793_s19  }
   0xe   : > { %2771 = sst [smem:[#allocation15_spill]] %s1793_s19  ;;  %p47_p0 = scmp.ne.s32.totalorder %s1773_s14, %s1769_s13 }
   0xf   : > { %p48_p1 = scmp.eq.s32.totalorder %s1793_s19, 0  ;;  %p53_p2 = scmp.ne.s32.totalorder %s1769_s13, %s1765_s12 }
  0x10   : > { %p1884_p3 = scmp.eq.s32.totalorder %s1373_s20, 0  ;;  %p97_p5 = scmp.ne.s32.totalorder %s1761_s11, %s1757_s10 }
  0x11   : > { %p1889_p4 = por %p48_p1, %p47_p0  ;;  %p98_p7 = scmp.eq.s32.totalorder %s1373_s20, 3 }
  0x12   : > { %p1897_p6 = por %p1884_p3, %p53_p2  ;;  %p103_p8 = scmp.ne.s32.totalorder %s1757_s10, %s1753_s9 }
  0x13   : > { %p104_p9 = scmp.eq.s32.totalorder %s1374_s21, 3  ;;  %p1903_p10 = por %p98_p7, %p97_p5 }
  0x14   : > { %s2774_s26 = scalar_select %p1897_p6, 1, 0 }
  0x15   : > { %s2775_s27 = scalar_select %p1903_p10, 1, 0 }
  0x16   : > { %p1375_p11 = scmp.ge.s32.totalorder %s1793_s19, 1  ;;  %p1908_p12 = por %p104_p9, %p103_p8 }
  0x17   : > { %p111_p13 = scmp.lt.s32.totalorder %s1793_s19, 5  ;;  %s2778_s1 = sld [smem:[#allocation18_spill]] }
  0x18   : > { %s2776_s28 = scalar_select %p1908_p12, 1, 0 }
  0x19   : > { %p1916_p0 = pnand %p1375_p11, %p111_p13  ;;  %p1515_p2 = scmp.lt.s32.totalorder %s1793_s19, 4 }
  0x1a   : > { %2777 = sst [smem:[#allocation16_spill]] %s2776_s28 }
  0x1b   : > { %s2779_s4 = scalar_select %p1916_p0, 1, 0 }
  0x1c   : > { %p1502_p1 = pneg %p1916_p0  ;;  %p1927_p7 = pnand %p1515_p2, %p1889_p4 }
  0x1d   : > { %s124_s3 = sshll.u32 %s2778_s1, 4  ;;  %s125_s3 = int_to_ptr.vmem [resolvable:$true] %s124_s3 }
  0x1e   : > { %p1503_p5 = pnand %p1502_p1, %p1884_p3  ;;  %s1626_s6 = scalar_lea.vmem %s125_s3, 16 }
  0x1f   : > { %p1627_p8 = scmp.ne.s32.totalorder %s125_s3, %s1626_s6  ;;  %p1634_p13 = scmp.lt.s32.totalorder %s125_s3, %s125_s3 }
  0x20   : > { %p1628_p9 = pneg %p1503_p5  ;;  %p1635_p10 = scmp.lt.s32.totalorder %s1626_s6, %s1626_s6 }
  0x22   : > { %p1629_p12 = pnand %p1628_p9, %p1627_p8  ;;  %p1636_p6 = por %p1635_p10, %p1634_p13 }
  0x24   : > { %p1630_p11 = pneg %p1629_p12 }
  0x26   : > { %p1637_p0 = pnand %p1636_p6, %p1630_p11 }
  0x28   : > { %1640 = shalt.err (!%p1637_p0)
}
  0x29   : > { %s1795_s7 = smov [#allocation8]   ;;  %s28_s8 = sadd.s32 1, %s1785_s17 }
  0x2a   : > { %1505 = dma.vmem_to_smem (!%p1503_p5), %s125_s3, 16, %s1795_s7, [#allocation7]  }
  0x2b   : > { %s31_s12 = sadd.s32 1, %s1789_s18  ;;  %p29_p4 = scmp.ge.s32.totalorder %s28_s8, 2 }
  0x2c   : > { %s135_s20 = sand.u32 1, %s1773_s14   ;;  %s1492_s29 = sshll.u32 %s1785_s17, 2 }
  0x2d   : > { %s1378_s21 = sshll.u32 %s135_s20, 5  ;;  %s2804_s8 = smov (%p29_p4, %s28_s8), 0 }
  0x2e   : > { %2781 = sst [smem:[#allocation17_spill]] %s2804_s8  ;;  %s2806_s12 = smov (!%p29_p4, %s31_s12), %s1789_s18 }
  0x2f   : > { %s36_s25 = ssub.s32 %s1785_s17, %s2804_s8  ;;  %p33_p6 = scmp.ge.s32.totalorder %s2806_s12, 2 }
  0x30   : > { %s1381_s30 = sshll.u32 %s1789_s18, 3  ;;  %s139_s3 = scalar_lea.vmem [#allocation4], %s1378_s21 }
  0x31   : > { %s149_s6 = sshll.u32 %s139_s3, 4  ;;  %s2808_s12 = smov (%p33_p6, %s2806_s12), 0  ;;  %s1943_s6 = int_to_ptr.vmem [resolvable:$true] %s149_s6 }
  0x32   : > { %s146_s7 = sadd.s32 %s1492_s29, %s1381_s30  ;;  %s35_s22 = ssub.s32 %s1789_s18, %s2808_s12 }
  0x33   : > { %s1382_s24 = sshll.u32 %s146_s7, 7  ;;  %s37_s1 = sor.u32 %s36_s25, %s35_s22 }
  0x34   : > { %p85_p10 = scmp.eq.s32.totalorder %s35_s22, 0  ;;  %p38_p12 = scmp.eq.s32.totalorder %s37_s1, 0 }
  0x35   : > { %s148_s28 = scalar_lea.hbm %s2756_s0, %s1382_s24  ;;  %s2782_s21 = sadd.s32 1, %s1761_s11 }
  0x36   : > { %s1953_s3 = scalar_select %p85_p10, %s1761_s11, %s2782_s21  }
  0x37   : > { %s2783_s9 = sadd.s32 1, %s1773_s14  ;;  %s136_s29 = scalar_lea.sflag [#allocation5], %s135_s20 }
  0x38   : > { %s1958_s19 = scalar_select %p38_p12, %s1773_s14, %s2783_s9  }
  0x39   : > { %p1643_p0 = pneg %p1927_p7  ;;  %s1654_s30 = scalar_lea.vmem %s1943_s6, 512 }
  0x3a   : > { %p1655_p1 = scmp.ne.s32.totalorder %s1943_s6, %s1654_s30  ;;  %s1796_s25 = smov [#allocation4]  }
  0x3b   : > { %s1659_s22 = sshll.u32 %s1796_s25, 4  ;;  %s1660_s22 = int_to_ptr.vmem [resolvable:$false] %s1659_s22 }
  0x3c   : > { %p1657_p2 = pnand %p1655_p1, %p1643_p0  ;;  %s1661_s1 = scalar_lea.vmem %s1660_s22, 1024 }
  0x3d   : > { %p1662_p8 = scmp.lt.s32.totalorder %s1943_s6, %s1660_s22  ;;  %p1663_p9 = scmp.lt.s32.totalorder %s1661_s1, %s1654_s30 }
  0x3e   : > { %p1658_p5 = pneg %p1657_p2 }
  0x3f   : > { %p1664_p11 = por %p1663_p9, %p1662_p8 }
  0x41   : > { %p1665_p13 = pnand %p1664_p11, %p1658_p5 }
  0x43   : > { %1668 = shalt.err (!%p1665_p13)
}
  0x44   : > { %s1797_s17 = smov 128   ;;  %s1798_s9 = smov 8  }
  0x45   : > { %1509 = dma.hbm_to_vmem [thread:$0]  (!%p1927_p7), %s148_s28, 512, %s1943_s6, %s136_s29, %s1797_s17, %s1797_s17, %s1798_s9  }
  0x46   : > { %p2784_p4 = scmp.ne.s32.totalorder %s2779_s4, 0 }
  0x47   : > { %s163_s24 = sand.u32 (!%p2784_p4), 1, %s1769_s13   ;;  %p2785_p6 = scmp.ne.s32.totalorder (!%p2784_p4), %s2774_s26, 0 }
  0x48   : > { %161 = sbr.rel (%p2784_p4) target bundleno = 632 (0x278), region = 28  ;;  %s1384_s8 = sshll.u32 (!%p2784_p4), %s163_s24, 5 }
  0x49   : > { %s164_s20 = scalar_lea.sflag (!%p2784_p4), [#allocation5], %s163_s24  ;;  %s167_s7 = scalar_lea.vmem (!%p2784_p4), [#allocation4], %s1384_s8 }
  0x4d   : > { %1740 = dma.done.wait (%p2785_p6), %s164_s20, 512  }
  0x4e   : > { %1742 = vsyncadd (%p2785_p6), %s164_s20, 4294966784 }
  0x4f   : > { %1744 = dma.done.wait (%p1884_p3), [#allocation7], 16  }
  0x50   : > { %1746 = vsyncadd (%p1884_p3), [#allocation7], 4294967280 }
  0x51   : > { %176 = sfence }
  0x52   : > { %s190_s28 = sand.u32 1, %s1757_s10   ;;  %v194_v0 = vld [vmem:[%s167_s7] sm:$0xff]  ;;  %v195_v1 = vld [vmem:[%s167_s7 + $0x8] sm:$0xff]  ;;  %v196_v2 = vld [vmem:[%s167_s7 + $0x10] sm:$0xff]  ;;  %vm198_vm0 = vcmask 130048   ;;  %p1387_p3 = scmp.ne.s32.totalorder %s1777_s15, 0 }
  0x53   : > { %s1386_s4 = sshll.u32 %s190_s28, 4  ;;  %v197_v3 = vld [vmem:[%s167_s7 + $0x18] sm:$0xff]  ;;  %v199_v4 = vsel %vm198_vm0, %v194_v0, -inf  ;;  %v200_v5 = vsel %vm198_vm0, %v196_v2, -inf  ;;  %v202_v6 = vsel %vm198_vm0, %v195_v1, -inf  ;;  %v205_v7 = vsel %vm198_vm0, %v194_v0, 0.0 }
  0x54   : > { %v201_v8 = vmax.f32 %v199_v4, %v200_v5  ;;  %v203_v9 = vsel %vm198_vm0, %v197_v3, -inf  ;;  %v206_v10 = vsel %vm198_vm0, %v196_v2, 0.0  ;;  %v208_v11 = vsel %vm198_vm0, %v195_v1, 0.0  ;;  %s1990_s23 = scalar_lea.vmem [#allocation9], %s1386_s4  ;;  %214 = sbr.rel (%p1387_p3) target bundleno = 95 (0x5f), region = 40 }
  0x55   : > { %v204_v12 = vmax.f32 %v202_v6, %v203_v9  ;;  %v207_v13 = vadd.f32 %v206_v10, %v205_v7  ;;  %v209_v14 = vsel %vm198_vm0, %v197_v3, 0.0 }
  0x56   : > { %v210_v15 = vadd.f32 %v209_v14, %v208_v11 }
  0x59   : > { %v1799_v16 = vmov 0.0  }
  0x5a   : > { %215 = vst [vmem:[#allocation2] sm:$0xff] %v1799_v16  ;;  %216 = vst [vmem:[#allocation2 + $0x8] sm:$0xff] %v1799_v16 }
  0x5b   : > { %217 = vst [vmem:[#allocation2 + $0x10] sm:$0xff] %v1799_v16  ;;  %218 = vst [vmem:[#allocation3] sm:$0xff] %v1799_v16 }
  0x5c   : > { %219 = vst [vmem:[#allocation3 + $0x8] sm:$0xff] %v1799_v16  ;;  %220 = vst [vmem:[#allocation3 + $0x10] sm:$0xff] %v1799_v16 }
  0x5d   : > { %221 = vst.msk [vmem:[#allocation2] sm:$0xff] %vm198_vm0, %v201_v8  ;;  %222 = vst.msk [vmem:[#allocation2 + $0x8] sm:$0xff] %vm198_vm0, %v204_v12 }
  0x5e   : > { %223 = vst.msk [vmem:[#allocation3] sm:$0xff] %vm198_vm0, %v207_v13  ;;  %224 = vst.msk [vmem:[#allocation3 + $0x8] sm:$0xff] %vm198_vm0, %v210_v15 }
  0x5f PF: > { %p1388_p7 = scmp.le.s32.totalorder %s1777_s15, 0 }
  0x61   : > { %228 = sbr.rel (%p1388_p7) target bundleno = 107 (0x6b), region = 44 }
  0x66   : > { %v229_v17 = vld [vmem:[#allocation2] sm:$0xff]  ;;  %v230_v18 = vld [vmem:[#allocation2 + $0x8] sm:$0xff]  ;;  %v235_v19 = vld [vmem:[#allocation3] sm:$0xff] }
  0x67   : > { %v231_v20 = vmax.f32 %v229_v17, %v201_v8  ;;  %v232_v21 = vmax.f32 %v230_v18, %v204_v12  ;;  %v237_v22 = vadd.f32 %v235_v19, %v207_v13  ;;  %v236_v23 = vld [vmem:[#allocation3 + $0x8] sm:$0xff] }
  0x68   : > { %v238_v24 = vadd.f32 %v236_v23, %v210_v15 }
  0x69   : > { %233 = vst.msk [vmem:[#allocation2] sm:$0xff] %vm198_vm0, %v231_v20  ;;  %234 = vst.msk [vmem:[#allocation2 + $0x8] sm:$0xff] %vm198_vm0, %v232_v21 }
  0x6a   : > { %239 = vst.msk [vmem:[#allocation3] sm:$0xff] %vm198_vm0, %v237_v22  ;;  %240 = vst.msk [vmem:[#allocation3 + $0x8] sm:$0xff] %vm198_vm0, %v238_v24 }
  0x6b PF: > { %p1389_p10 = scmp.ne.s32.totalorder %s1777_s15, 1 }
  0x6c   : > { %s1800_s15 = smov (!%p1389_p10), 2   ;;  %s1801_s26 = smov (!%p1389_p10), 3  }
  0x6d   : > { %244 = sbr.rel (%p1389_p10) target bundleno = 607 (0x25f), region = 48  ;;  %s1802_s5 = smov (!%p1389_p10), 1  }
  0x6e   : > { %s1803_s6 = smov (!%p1389_p10), 127   ;;  %s1804_s21 = smov (!%p1389_p10), 126  }
  0x6f   : > { %s1805_s29 = smov (!%p1389_p10), 125   ;;  %s1390_s30 = sld [smem:[#allocation8 + $0x1]] (!%p1389_p10) }
  0x70   : > { %s266_s25 = sld [smem:[#allocation8]] (!%p1389_p10) }
  0x71   : > { %s1391_s22 = sld [smem:[#allocation8 + $0x2]] (!%p1389_p10) }
  0x72   : > { %v2003_v25 = vld [vmem:[#allocation2] sm:$0xff]  ;;  %v2005_v26 = vld [vmem:[#allocation2 + $0x10] sm:$0xff]  ;;  %v257_v27 = vlaneseq  ;;  %v2007_v28 = vld [vmem:[#allocation2 + $0x8] sm:$0xff]  ;;  %s1392_s1 = sld [smem:[#allocation8 + $0x3]] }
  0x73   : > { %v254_v29 = vrot.slane %v2003_v25, 5  ;;  %v256_v30 = vrot.slane %v2005_v26, 5  ;;  %v255_v32 = vrot.slane %v2007_v28, 5  ;;  %v328_v35 = vrot.slane %v2003_v25, 6  ;;  %s2199_s17 = sld [smem:[#allocation8 + $0x4]] }
  0x74   : > { %v2011_v31 = vshrl.u32 %v257_v27, 7  ;;  %v329_v36 = vrot.slane %v2007_v28, 6  ;;  %v330_v37 = vrot.slane %v2005_v26, 6  ;;  %v400_v40 = vrot.slane %v2003_v25, 7  ;;  %s2201_s9 = sld [smem:[#allocation8 + $0x5]] }
  0x75   : > { %v401_v41 = vrot.slane %v2007_v28, 7  ;;  %v402_v42 = vrot.slane %v2005_v26, 7  ;;  %v539_v45 = vrot.slane %v2007_v28, 1  ;;  %v540_v46 = vrot.slane %v2005_v26, 1  ;;  %s2207_s24 = sld [smem:[#allocation8 + $0x6]] }
  0x76   : > { %vm259_vm1 = vcmp.lt.s32.totalorder %v2011_v31, 3  ;;  %vm331_vm2 = vcmp.lt.s32.totalorder %v2011_v31, 2  ;;  %vm403_vm3 = vcmp.lt.s32.totalorder %v2011_v31, 1  ;;  %v538_v47 = vrot.slane %v2003_v25, 1  ;;  %s2209_s8 = sld [smem:[#allocation8 + $0x7]] }
  0x77   : > { %v2017_v33 = vsel %vm259_vm1, %v256_v30, %v254_v29  ;;  %v2025_v34 = vsel %vm259_vm1, %v254_v29, %v255_v32  ;;  %v2053_v38 = vsel %vm331_vm2, %v328_v35, %v329_v36  ;;  %v2057_v39 = vsel %vm331_vm2, %v330_v37, %v328_v35  ;;  %s2218_s20 = sld [smem:[#allocation8 + $0x8]] }
  0x78   : > { %272 = vrot.lane.b32.xlu1 %v2017_v33, %s1800_s15  ;;  %262 = vrot.lane.b32.xlu0 %v2017_v33, %s1801_s26  ;;  %v2089_v43 = vsel %vm403_vm3, %v400_v40, %v401_v41  ;;  %v2093_v44 = vsel %vm403_vm3, %v402_v42, %v400_v40  ;;  %vm541_vm4 = vcmp.lt.s32.totalorder %v2011_v31, 7  ;;  %v611_v50 = vrot.slane %v2007_v28, 2  ;;  %s2221_s7 = sld [smem:[#allocation8 + $0xa]] }
  0x79   : > { %v2149_v48 = vsel %vm541_vm4, %v539_v45, %v540_v46  ;;  %v2153_v49 = vsel %vm541_vm4, %v538_v47, %v539_v45  ;;  %v612_v51 = vrot.slane %v2005_v26, 2  ;;  %v610_v52 = vrot.slane %v2003_v25, 2  ;;  %s2231_s4 = sld [smem:[#allocation8 + $0x9]] }
  0x7a   : > { %vm613_vm5 = vcmp.lt.s32.totalorder %v2011_v31, 6  ;;  %v277_v59 = vstv %s1390_s30  ;;  %v267_v60 = vstv %s266_s25  ;;  %v287_v63 = vstv %s1391_s22  ;;  %s1400_s30 = sld [smem:[#allocation8 + $0xb]] }
  0x7b   : > { %v2185_v55 = vsel %vm613_vm5, %v611_v50, %v612_v51  ;;  %v2189_v56 = vsel %vm613_vm5, %v610_v52, %v611_v50  ;;  %v293_v8 = vstv %s1392_s1  ;;  %v303_v17 = vstv %s2199_s17  ;;  %s2260_s25 = sld [smem:[#allocation8 + $0xc]] }
  0x7c   : > { %274 = vrot.lane.b32.xlu1 %v2025_v34, %s1800_s15  ;;  %264 = vrot.lane.b32.xlu0 %v2025_v34, %s1801_s26  ;;  %v295_v14 = vmul.f32 %v293_v8, %v2025_v34  ;;  %v294_v15 = vmul.f32 %v293_v8, %v2017_v33  ;;  %v313_v18 = vstv %s2201_s9  ;;  %v323_v27 = vstv %s2207_s24  ;;  %s2266_s22 = sld [smem:[#allocation8 + $0xd]] }
  0x7d   : > { %v683_v29 = vrot.slane %v2007_v28, 3  ;;  %v684_v30 = vrot.slane %v2005_v26, 3  ;;  %v682_v32 = vrot.slane %v2003_v25, 3  ;;  %vm685_vm6 = vcmp.lt.s32.totalorder %v2011_v31, 5  ;;  %s2268_s1 = sld [smem:[#allocation8 + $0xe]] }
  0x7e   : > { %v339_v35 = vstv %s2209_s8  ;;  %v349_v26 = vstv %s2218_s20  ;;  %s2274_s17 = sld [smem:[#allocation8 + $0xf]] }
  0x7f   : > { %v2242_v46 = vsel %vm685_vm6, %v683_v29, %v684_v30  ;;  %v2246_v47 = vsel %vm685_vm6, %v682_v32, %v683_v29  ;;  %s2283_s9 = sld [smem:[#allocation8 + $0x11]] }
  0x80   : > { %284 = vrot.lane.b32.xlu1 %v2025_v34, %s1802_s5  ;;  %282 = vrot.lane.b32.xlu0 %v2017_v33, %s1802_s5  ;;  %s2293_s24 = sld [smem:[#allocation8 + $0x10]] }
  0x81   : > { %s1407_s8 = sld [smem:[#allocation8 + $0x12]] }
  0x82   : > { %v395_v32 = vstv %s2266_s22  ;;  %s1408_s20 = sld [smem:[#allocation8 + $0x13]] }
  0x83   : > { %s2362_s22 = sld [smem:[#allocation8 + $0x18]] }
  0x84   : > { %300 = vrot.lane.b32.xlu1 %v2025_v34, %s1803_s6  ;;  %298 = vrot.lane.b32.xlu0 %v2017_v33, %s1803_s6 }
  0x88   : > { %310 = vrot.lane.b32.xlu1 %v2025_v34, %s1804_s21  ;;  %308 = vrot.lane.b32.xlu0 %v2017_v33, %s1804_s21 }
  0x8c   : > { %320 = vrot.lane.b32.xlu1 %v2025_v34, %s1805_s29  ;;  %318 = vrot.lane.b32.xlu0 %v2017_v33, %s1805_s29 }
  0x90   : > { %336 = vrot.lane.b32.xlu1 %v2053_v38, %s1801_s26  ;;  %334 = vrot.lane.b32.xlu0 %v2057_v39, %s1801_s26 }
  0x94   : > { %346 = vrot.lane.b32.xlu1 %v2053_v38, %s1800_s15  ;;  %344 = vrot.lane.b32.xlu0 %v2057_v39, %s1800_s15 }
  0x98   : > { %356 = vrot.lane.b32.xlu1 %v2053_v38, %s1802_s5  ;;  %354 = vrot.lane.b32.xlu0 %v2057_v39, %s1802_s5 }
  0x9c   : > { %372 = vrot.lane.b32.xlu1 %v2053_v38, %s1803_s6  ;;  %370 = vrot.lane.b32.xlu0 %v2057_v39, %s1803_s6 }
  0xa0   : > { %382 = vrot.lane.b32.xlu1 %v2053_v38, %s1804_s21  ;;  %380 = vrot.lane.b32.xlu0 %v2057_v39, %s1804_s21 }
  0xa4   : > { %392 = vrot.lane.b32.xlu1 %v2053_v38, %s1805_s29  ;;  %390 = vrot.lane.b32.xlu0 %v2057_v39, %s1805_s29 }
  0xa8   : > { %408 = vrot.lane.b32.xlu1 %v2089_v43, %s1801_s26  ;;  %406 = vrot.lane.b32.xlu0 %v2093_v44, %s1801_s26 }
  0xac   : > { %418 = vrot.lane.b32.xlu1 %v2089_v43, %s1800_s15  ;;  %416 = vrot.lane.b32.xlu0 %v2093_v44, %s1800_s15 }
  0xb0   : > { %428 = vrot.lane.b32.xlu1 %v2089_v43, %s1802_s5  ;;  %426 = vrot.lane.b32.xlu0 %v2093_v44, %s1802_s5 }
  0xb4   : > { %444 = vrot.lane.b32.xlu1 %v2089_v43, %s1803_s6  ;;  %442 = vrot.lane.b32.xlu0 %v2093_v44, %s1803_s6 }
  0xb8   : > { %454 = vrot.lane.b32.xlu1 %v2089_v43, %s1804_s21  ;;  %452 = vrot.lane.b32.xlu0 %v2093_v44, %s1804_s21 }
  0xbc   : > { %464 = vrot.lane.b32.xlu1 %v2089_v43, %s1805_s29  ;;  %462 = vrot.lane.b32.xlu0 %v2093_v44, %s1805_s29 }
  0xc0   : > { %474 = vrot.lane.b32.xlu1 %v2007_v28, %s1801_s26  ;;  %472 = vrot.lane.b32.xlu0 %v2003_v25, %s1801_s26 }
  0xc4   : > { %484 = vrot.lane.b32.xlu1 %v2007_v28, %s1800_s15  ;;  %482 = vrot.lane.b32.xlu0 %v2003_v25, %s1800_s15 }
  0xc8   : > { %494 = vrot.lane.b32.xlu1 %v2007_v28, %s1802_s5  ;;  %492 = vrot.lane.b32.xlu0 %v2003_v25, %s1802_s5 }
  0xcc   : > { %510 = vrot.lane.b32.xlu1 %v2007_v28, %s1803_s6  ;;  %508 = vrot.lane.b32.xlu0 %v2003_v25, %s1803_s6 }
  0xd0   : > { %520 = vrot.lane.b32.xlu1 %v2007_v28, %s1804_s21  ;;  %518 = vrot.lane.b32.xlu0 %v2003_v25, %s1804_s21 }
  0xd4   : > { %530 = vrot.lane.b32.xlu1 %v2007_v28, %s1805_s29  ;;  %528 = vrot.lane.b32.xlu0 %v2003_v25, %s1805_s29 }
  0xd8   : > { %546 = vrot.lane.b32.xlu1 %v2149_v48, %s1801_s26  ;;  %544 = vrot.lane.b32.xlu0 %v2153_v49, %s1801_s26 }
  0xdc   : > { %556 = vrot.lane.b32.xlu1 %v2149_v48, %s1800_s15  ;;  %554 = vrot.lane.b32.xlu0 %v2153_v49, %s1800_s15 }
  0xe0   : > { %566 = vrot.lane.b32.xlu1 %v2149_v48, %s1802_s5  ;;  %564 = vrot.lane.b32.xlu0 %v2153_v49, %s1802_s5 }
  0xe4   : > { %582 = vrot.lane.b32.xlu1 %v2149_v48, %s1803_s6  ;;  %580 = vrot.lane.b32.xlu0 %v2153_v49, %s1803_s6 }
  0xe8   : > { %592 = vrot.lane.b32.xlu1 %v2149_v48, %s1804_s21  ;;  %590 = vrot.lane.b32.xlu0 %v2153_v49, %s1804_s21 }
  0xea   : > { %v273_v53 = vpop.permute.xlu1 %272  ;;  %v263_v54 = vpop.permute.xlu0 %262 }
  0xeb   : > { %v278_v0 = vmul.f32 %v277_v59, %v273_v53  ;;  %v268_v1 = vmul.f32 %v267_v60, %v263_v54 }
  0xec   : > { %602 = vrot.lane.b32.xlu1 %v2149_v48, %s1805_s29  ;;  %600 = vrot.lane.b32.xlu0 %v2153_v49, %s1805_s29 }
  0xed   : > { %v280_v9 = vadd.f32 %v278_v0, %v268_v1 }
  0xee   : > { %v275_v57 = vpop.permute.xlu1 %274  ;;  %v265_v58 = vpop.permute.xlu0 %264 }
  0xef   : > { %v279_v2 = vmul.f32 %v277_v59, %v275_v57  ;;  %v269_v3 = vmul.f32 %v267_v60, %v265_v58  ;;  %v365_v58 = vstv %s2221_s7  ;;  %s2329_s7 = sld [smem:[#allocation8 + $0x14]] }
  0xf0   : > { %618 = vrot.lane.b32.xlu1 %v2185_v55, %s1801_s26  ;;  %616 = vrot.lane.b32.xlu0 %v2189_v56, %s1801_s26 }
  0xf1   : > { %v281_v10 = vadd.f32 %v279_v2, %v269_v3  ;;  %v367_v2 = vmul.f32 %v365_v58, %v2053_v38 }
  0xf2   : > { %v285_v61 = vpop.permute.xlu1 %284  ;;  %v283_v62 = vpop.permute.xlu0 %282 }
  0xf3   : > { %v289_v6 = vmul.f32 %v287_v63, %v285_v61  ;;  %v288_v7 = vmul.f32 %v287_v63, %v283_v62  ;;  %v359_v63 = vstv %s2231_s4  ;;  %s2335_s4 = sld [smem:[#allocation8 + $0x15]] }
  0xf4   : > { %628 = vrot.lane.b32.xlu1 %v2185_v55, %s1800_s15  ;;  %626 = vrot.lane.b32.xlu0 %v2189_v56, %s1800_s15 }
  0xf5   : > { %v291_v13 = vadd.f32 %v289_v6, %v281_v10  ;;  %v290_v16 = vadd.f32 %v288_v7, %v280_v9 }
  0xf6   : > { %v301_v4 = vpop.permute.xlu1 %300  ;;  %v299_v5 = vpop.permute.xlu0 %298 }
  0xf7   : > { %v297_v21 = vadd.f32 %v295_v14, %v291_v13  ;;  %v296_v22 = vadd.f32 %v294_v15, %v290_v16  ;;  %v305_v23 = vmul.f32 %v303_v17, %v301_v4  ;;  %v304_v24 = vmul.f32 %v303_v17, %v299_v5  ;;  %v248_v14 = vld [vmem:[#allocation3] sm:$0xff]  ;;  %v249_v15 = vld [vmem:[#allocation3 + $0x8] sm:$0xff]  ;;  %v250_v16 = vld [vmem:[#allocation3 + $0x10] sm:$0xff] }
  0xf8   : > { %638 = vrot.lane.b32.xlu1 %v2185_v55, %s1802_s5  ;;  %636 = vrot.lane.b32.xlu0 %v2189_v56, %s1802_s5  ;;  %v366_v4 = vmul.f32 %v365_v58, %v2057_v39 }
  0xf9   : > { %v307_v40 = vadd.f32 %v305_v23, %v297_v21  ;;  %v306_v41 = vadd.f32 %v304_v24, %v296_v22  ;;  %v2278_v21 = vmul.f32 0.25, %v249_v15  ;;  %v2280_v22 = vmul.f32 0.25, %v250_v16 }
  0xfa   : > { %v311_v11 = vpop.permute.xlu1 %310  ;;  %v309_v12 = vpop.permute.xlu0 %308  ;;  %v385_v23 = vstv %s2260_s25  ;;  %s2346_s25 = sld [smem:[#allocation8 + $0x17]] }
  0xfb   : > { %v315_v33 = vmul.f32 %v313_v18, %v311_v11  ;;  %v314_v34 = vmul.f32 %v313_v18, %v309_v12 }
  0xfc   : > { %654 = vrot.lane.b32.xlu1 %v2185_v55, %s1803_s6  ;;  %652 = vrot.lane.b32.xlu0 %v2189_v56, %s1803_s6 }
  0xfd   : > { %v317_v50 = vadd.f32 %v315_v33, %v307_v40  ;;  %v316_v51 = vadd.f32 %v314_v34, %v306_v41  ;;  %v755_v34 = vrot.slane %v2278_v21, 5  ;;  %v411_v40 = vstv %s2268_s1  ;;  %s2370_s1 = sld [smem:[#allocation8 + $0x19]] }
  0xfe   : > { %v321_v19 = vpop.permute.xlu1 %320  ;;  %v319_v20 = vpop.permute.xlu0 %318 }
  0xff   : > { %v325_v42 = vmul.f32 %v323_v27, %v321_v19  ;;  %v324_v45 = vmul.f32 %v323_v27, %v319_v20  ;;  %v375_v19 = vstv %s1400_s30  ;;  %v2276_v20 = vmul.f32 0.25, %v248_v14  ;;  %s2340_s30 = sld [smem:[#allocation8 + $0x16]] }
 0x100   : > { %664 = vrot.lane.b32.xlu1 %v2185_v55, %s1804_s21  ;;  %662 = vrot.lane.b32.xlu0 %v2189_v56, %s1804_s21 }
 0x101   : > { %v327_v59 = vadd.f32 %v325_v42, %v317_v50  ;;  %v326_v60 = vadd.f32 %v324_v45, %v316_v51  ;;  %v754_v33 = vrot.slane %v2276_v20, 5 }
 0x102   : > { %v337_v36 = vpop.permute.xlu1 %336  ;;  %v335_v37 = vpop.permute.xlu0 %334 }
 0x103   : > { %v341_v52 = vmul.f32 %v339_v35, %v337_v36  ;;  %v340_v53 = vmul.f32 %v339_v35, %v335_v37  ;;  %v756_v35 = vrot.slane %v2280_v22, 5 }
 0x104   : > { %674 = vrot.lane.b32.xlu1 %v2185_v55, %s1805_s29  ;;  %672 = vrot.lane.b32.xlu0 %v2189_v56, %s1805_s29 }
 0x105   : > { %v343_v0 = vadd.f32 %v341_v52, %v327_v59  ;;  %v342_v1 = vadd.f32 %v340_v53, %v326_v60  ;;  %v421_v52 = vstv %s2274_s17  ;;  %v2303_v53 = vsel %vm259_vm1, %v754_v33, %v755_v34  ;;  %s2372_s17 = sld [smem:[#allocation8 + $0x1a]] }
 0x106   : > { %v347_v54 = vpop.permute.xlu1 %346  ;;  %v345_v57 = vpop.permute.xlu0 %344  ;;  %v457_v34 = vstv %s1408_s20  ;;  %s2393_s20 = sld [smem:[#allocation8 + $0x1f]] }
 0x107   : > { %v351_v61 = vmul.f32 %v349_v26, %v347_v54  ;;  %v350_v62 = vmul.f32 %v349_v26, %v345_v57  ;;  %v2307_v54 = vsel %vm259_vm1, %v756_v35, %v754_v33 }
 0x108   : > { %690 = vrot.lane.b32.xlu1 %v2242_v46, %s1801_s26  ;;  %688 = vrot.lane.b32.xlu0 %v2246_v47, %s1801_s26 }
 0x109   : > { %v353_v6 = vadd.f32 %v351_v61, %v343_v0  ;;  %v352_v7 = vadd.f32 %v350_v62, %v342_v1 }
 0x10a   : > { %v357_v3 = vpop.permute.xlu1 %356  ;;  %v355_v5 = vpop.permute.xlu0 %354 }
 0x10b   : > { %v361_v8 = vmul.f32 %v359_v63, %v357_v3  ;;  %v360_v9 = vmul.f32 %v359_v63, %v355_v5  ;;  %v437_v63 = vstv %s2283_s9  ;;  %s2379_s9 = sld [smem:[#allocation8 + $0x1b]] }
 0x10c   : > { %700 = vrot.lane.b32.xlu1 %v2242_v46, %s1800_s15  ;;  %698 = vrot.lane.b32.xlu0 %v2246_v47, %s1800_s15 }
 0x10d   : > { %v363_v10 = vadd.f32 %v361_v8, %v353_v6  ;;  %v362_v11 = vadd.f32 %v360_v9, %v352_v7  ;;  %v439_v7 = vmul.f32 %v437_v63, %v2089_v43  ;;  %v438_v9 = vmul.f32 %v437_v63, %v2093_v44 }
 0x10e   : > { %v373_v12 = vpop.permute.xlu1 %372  ;;  %v371_v13 = vpop.permute.xlu0 %370 }
 0x10f   : > { %v369_v38 = vadd.f32 %v367_v2, %v363_v10  ;;  %v368_v39 = vadd.f32 %v366_v4, %v362_v11  ;;  %v377_v29 = vmul.f32 %v375_v19, %v373_v12  ;;  %v376_v30 = vmul.f32 %v375_v19, %v371_v13 }
 0x110   : > { %710 = vrot.lane.b32.xlu1 %v2242_v46, %s1802_s5  ;;  %708 = vrot.lane.b32.xlu0 %v2246_v47, %s1802_s5  ;;  %v431_v4 = vstv %s2293_s24  ;;  %s2381_s24 = sld [smem:[#allocation8 + $0x1c]] }
 0x111   : > { %v379_v45 = vadd.f32 %v377_v29, %v369_v38  ;;  %v378_v26 = vadd.f32 %v376_v30, %v368_v39  ;;  %v827_v29 = vrot.slane %v2280_v22, 6  ;;  %v447_v30 = vstv %s1407_s8  ;;  %s2390_s8 = sld [smem:[#allocation8 + $0x1d]] }
 0x112   : > { %v383_v17 = vpop.permute.xlu1 %382  ;;  %v381_v18 = vpop.permute.xlu0 %380 }
 0x113   : > { %v387_v36 = vmul.f32 %v385_v23, %v383_v17  ;;  %v386_v37 = vmul.f32 %v385_v23, %v381_v18 }
 0x114   : > { %726 = vrot.lane.b32.xlu1 %v2242_v46, %s1803_s6  ;;  %724 = vrot.lane.b32.xlu0 %v2246_v47, %s1803_s6 }
 0x115   : > { %v389_v57 = vadd.f32 %v387_v36, %v379_v45  ;;  %v388_v58 = vadd.f32 %v386_v37, %v378_v26 }
 0x116   : > { %v393_v24 = vpop.permute.xlu1 %392  ;;  %v391_v27 = vpop.permute.xlu0 %390 }
 0x117   : > { %v397_v50 = vmul.f32 %v395_v32, %v393_v24  ;;  %v396_v51 = vmul.f32 %v395_v32, %v391_v27  ;;  %v825_v24 = vrot.slane %v2276_v20, 6  ;;  %v826_v27 = vrot.slane %v2278_v21, 6 }
 0x118   : > { %736 = vrot.lane.b32.xlu1 %v2242_v46, %s1804_s21  ;;  %734 = vrot.lane.b32.xlu0 %v2246_v47, %s1804_s21 }
 0x119   : > { %v399_v0 = vadd.f32 %v397_v50, %v389_v57  ;;  %v398_v1 = vadd.f32 %v396_v51, %v388_v58  ;;  %v2350_v37 = vsel %vm331_vm2, %v825_v24, %v826_v27  ;;  %v477_v51 = vstv %s2335_s4  ;;  %s1421_s4 = sld [smem:[#allocation8 + $0x20]] }
 0x11a   : > { %v409_v41 = vpop.permute.xlu1 %408  ;;  %v407_v42 = vpop.permute.xlu0 %406 }
 0x11b   : > { %v413_v59 = vmul.f32 %v411_v40, %v409_v41  ;;  %v412_v60 = vmul.f32 %v411_v40, %v407_v42  ;;  %v2354_v40 = vsel %vm331_vm2, %v827_v29, %v825_v24  ;;  %v467_v41 = vstv %s2329_s7  ;;  %s2403_s7 = sld [smem:[#allocation8 + $0x1e]] }
 0x11c   : > { %746 = vrot.lane.b32.xlu1 %v2242_v46, %s1805_s29  ;;  %744 = vrot.lane.b32.xlu0 %v2246_v47, %s1805_s29 }
 0x11d   : > { %v415_v5 = vadd.f32 %v413_v59, %v399_v0  ;;  %v414_v6 = vadd.f32 %v412_v60, %v398_v1  ;;  %v487_v60 = vstv %s2340_s30  ;;  %s1422_s30 = sld [smem:[#allocation8 + $0x21]] }
 0x11e   : > { %v419_v61 = vpop.permute.xlu1 %418  ;;  %v417_v62 = vpop.permute.xlu0 %416 }
 0x11f   : > { %v423_v2 = vmul.f32 %v421_v52, %v419_v61  ;;  %v422_v3 = vmul.f32 %v421_v52, %v417_v62 }
 0x120   : > { %761 = vrot.lane.b32.xlu1 %v2303_v53, %s1801_s26  ;;  %759 = vrot.lane.b32.xlu0 %v2307_v54, %s1801_s26 }
 0x121   : > { %v425_v11 = vadd.f32 %v423_v2, %v415_v5  ;;  %v424_v12 = vadd.f32 %v422_v3, %v414_v6  ;;  %v497_v3 = vstv %s2346_s25  ;;  %s1423_s25 = sld [smem:[#allocation8 + $0x22]] }
 0x122   : > { %v429_v8 = vpop.permute.xlu1 %428  ;;  %v427_v10 = vpop.permute.xlu0 %426 }
 0x123   : > { %v433_v13 = vmul.f32 %v431_v4, %v429_v8  ;;  %v432_v38 = vmul.f32 %v431_v4, %v427_v10 }
 0x124   : > { %771 = vrot.lane.b32.xlu1 %v2303_v53, %s1800_s15  ;;  %769 = vrot.lane.b32.xlu0 %v2307_v54, %s1800_s15 }
 0x125   : > { %v435_v39 = vadd.f32 %v433_v13, %v425_v11  ;;  %v434_v14 = vadd.f32 %v432_v38, %v424_v12  ;;  %v503_v38 = vstv %s2362_s22  ;;  %s1424_s22 = sld [smem:[#allocation8 + $0x23]] }
 0x126   : > { %v445_v15 = vpop.permute.xlu1 %444  ;;  %v443_v16 = vpop.permute.xlu0 %442 }
 0x127   : > { %v441_v17 = vadd.f32 %v439_v7, %v435_v39  ;;  %v440_v43 = vadd.f32 %v438_v9, %v434_v14  ;;  %v449_v35 = vmul.f32 %v447_v30, %v445_v15  ;;  %v448_v36 = vmul.f32 %v447_v30, %v443_v16 }
 0x128   : > { %781 = vrot.lane.b32.xlu1 %v2303_v53, %s1802_s5  ;;  %779 = vrot.lane.b32.xlu0 %v2307_v54, %s1802_s5 }
 0x129   : > { %v451_v52 = vadd.f32 %v449_v35, %v441_v17  ;;  %v450_v57 = vadd.f32 %v448_v36, %v440_v43  ;;  %v505_v17 = vmul.f32 %v503_v38, %v2007_v28  ;;  %v898_v35 = vrot.slane %v2280_v22, 7 }
 0x12a   : > { %v455_v44 = vpop.permute.xlu1 %454  ;;  %v453_v18 = vpop.permute.xlu0 %452 }
 0x12b   : > { %v459_v26 = vmul.f32 %v457_v34, %v455_v44  ;;  %v458_v50 = vmul.f32 %v457_v34, %v453_v18  ;;  %v504_v44 = vmul.f32 %v503_v38, %v2003_v25  ;;  %v897_v34 = vrot.slane %v2278_v21, 7 }
 0x12c   : > { %797 = vrot.lane.b32.xlu1 %v2303_v53, %s1803_s6  ;;  %795 = vrot.lane.b32.xlu0 %v2307_v54, %s1803_s6 }
 0x12d   : > { %v461_v63 = vadd.f32 %v459_v26, %v451_v52  ;;  %v460_v0 = vadd.f32 %v458_v50, %v450_v57 }
 0x12e   : > { %v465_v19 = vpop.permute.xlu1 %464  ;;  %v463_v23 = vpop.permute.xlu0 %462 }
 0x12f   : > { %v469_v58 = vmul.f32 %v467_v41, %v465_v19  ;;  %v468_v59 = vmul.f32 %v467_v41, %v463_v23  ;;  %v513_v19 = vstv %s2370_s1  ;;  %v523_v23 = vstv %s2372_s17  ;;  %s2439_s1 = sld [smem:[#allocation8 + $0x24]] }
 0x130   : > { %807 = vrot.lane.b32.xlu1 %v2303_v53, %s1804_s21  ;;  %805 = vrot.lane.b32.xlu0 %v2307_v54, %s1804_s21  ;;  %s2441_s17 = sld [smem:[#allocation8 + $0x26]] }
 0x131   : > { %v471_v4 = vadd.f32 %v469_v58, %v461_v63  ;;  %v470_v5 = vadd.f32 %v468_v59, %v460_v0  ;;  %v559_v58 = vstv %s2390_s8  ;;  %s1429_s8 = sld [smem:[#allocation8 + $0x28]] }
 0x132   : > { %v475_v32 = vpop.permute.xlu1 %474  ;;  %v473_v33 = vpop.permute.xlu0 %472 }
 0x133   : > { %v479_v1 = vmul.f32 %v477_v51, %v475_v32  ;;  %v478_v2 = vmul.f32 %v477_v51, %v473_v33  ;;  %v533_v32 = vstv %s2379_s9  ;;  %v896_v33 = vrot.slane %v2276_v20, 7  ;;  %s2447_s9 = sld [smem:[#allocation8 + $0x25]] }
 0x134   : > { %817 = vrot.lane.b32.xlu1 %v2303_v53, %s1805_s29  ;;  %815 = vrot.lane.b32.xlu0 %v2307_v54, %s1805_s29 }
 0x135   : > { %v481_v10 = vadd.f32 %v479_v1, %v471_v4  ;;  %v480_v11 = vadd.f32 %v478_v2, %v470_v5  ;;  %v2413_v59 = vsel %vm403_vm3, %v896_v33, %v897_v34 }
 0x136   : > { %v485_v42 = vpop.permute.xlu1 %484  ;;  %v483_v45 = vpop.permute.xlu0 %482 }
 0x137   : > { %v489_v6 = vmul.f32 %v487_v60, %v485_v42  ;;  %v488_v7 = vmul.f32 %v487_v60, %v483_v45  ;;  %v549_v42 = vstv %s2381_s24  ;;  %v2417_v60 = vsel %vm403_vm3, %v898_v35, %v896_v33  ;;  %s2455_s24 = sld [smem:[#allocation8 + $0x27]] }
 0x138   : > { %832 = vrot.lane.b32.xlu1 %v2350_v37, %s1801_s26  ;;  %830 = vrot.lane.b32.xlu0 %v2354_v40, %s1801_s26  ;;  %v621_v35 = vstv %s1424_s22  ;;  %s2498_s22 = sld [smem:[#allocation8 + $0x2e]] }
 0x139   : > { %v491_v39 = vadd.f32 %v489_v6, %v481_v10  ;;  %v490_v14 = vadd.f32 %v488_v7, %v480_v11 }
 0x13a   : > { %v495_v61 = vpop.permute.xlu1 %494  ;;  %v493_v62 = vpop.permute.xlu0 %492 }
 0x13b   : > { %v499_v12 = vmul.f32 %v497_v3, %v495_v61  ;;  %v498_v13 = vmul.f32 %v497_v3, %v493_v62  ;;  %v575_v3 = vstv %s2393_s20  ;;  %s1430_s20 = sld [smem:[#allocation8 + $0x29]] }
 0x13c   : > { %842 = vrot.lane.b32.xlu1 %v2350_v37, %s1800_s15  ;;  %840 = vrot.lane.b32.xlu0 %v2354_v40, %s1800_s15  ;;  %v577_v11 = vmul.f32 %v575_v3, %v2149_v48 }
 0x13d   : > { %v501_v43 = vadd.f32 %v499_v12, %v491_v39  ;;  %v500_v18 = vadd.f32 %v498_v13, %v490_v14  ;;  %v576_v13 = vmul.f32 %v575_v3, %v2153_v49 }
 0x13e   : > { %v511_v8 = vpop.permute.xlu1 %510  ;;  %v509_v9 = vpop.permute.xlu0 %508 }
 0x13f   : > { %v507_v28 = vadd.f32 %v505_v17, %v501_v43  ;;  %v506_v29 = vadd.f32 %v504_v44, %v500_v18  ;;  %v515_v30 = vmul.f32 %v513_v19, %v511_v8  ;;  %v514_v25 = vmul.f32 %v513_v19, %v509_v9 }
 0x140   : > { %852 = vrot.lane.b32.xlu1 %v2350_v37, %s1802_s5  ;;  %850 = vrot.lane.b32.xlu0 %v2354_v40, %s1802_s5  ;;  %v569_v8 = vstv %s2403_s7  ;;  %s2473_s7 = sld [smem:[#allocation8 + $0x2a]] }
 0x141   : > { %v517_v50 = vadd.f32 %v515_v30, %v507_v28  ;;  %v516_v51 = vadd.f32 %v514_v25, %v506_v29 }
 0x142   : > { %v521_v15 = vpop.permute.xlu1 %520  ;;  %v519_v16 = vpop.permute.xlu0 %518 }
 0x143   : > { %v525_v36 = vmul.f32 %v523_v23, %v521_v15  ;;  %v524_v41 = vmul.f32 %v523_v23, %v519_v16 }
 0x144   : > { %868 = vrot.lane.b32.xlu1 %v2350_v37, %s1803_s6  ;;  %866 = vrot.lane.b32.xlu0 %v2354_v40, %s1803_s6 }
 0x145   : > { %v527_v61 = vadd.f32 %v525_v36, %v517_v50  ;;  %v526_v62 = vadd.f32 %v524_v41, %v516_v51  ;;  %v631_v51 = vstv %s2439_s1  ;;  %s1436_s1 = sld [smem:[#allocation8 + $0x2f]] }
 0x146   : > { %v531_v24 = vpop.permute.xlu1 %530  ;;  %v529_v27 = vpop.permute.xlu0 %528 }
 0x147   : > { %v535_v52 = vmul.f32 %v533_v32, %v531_v24  ;;  %v534_v57 = vmul.f32 %v533_v32, %v529_v27  ;;  %v585_v24 = vstv %s1421_s4  ;;  %v595_v27 = vstv %s1422_s30  ;;  %s2479_s4 = sld [smem:[#allocation8 + $0x2b]] }
 0x148   : > { %878 = vrot.lane.b32.xlu1 %v2350_v37, %s1804_s21  ;;  %876 = vrot.lane.b32.xlu0 %v2354_v40, %s1804_s21  ;;  %v605_v32 = vstv %s1423_s25  ;;  %s2481_s30 = sld [smem:[#allocation8 + $0x2c]] }
 0x149   : > { %v537_v4 = vadd.f32 %v535_v52, %v527_v61  ;;  %v536_v5 = vadd.f32 %v534_v57, %v526_v62  ;;  %s2489_s25 = sld [smem:[#allocation8 + $0x2d]] }
 0x14a   : > { %v547_v45 = vpop.permute.xlu1 %546  ;;  %v545_v26 = vpop.permute.xlu0 %544 }
 0x14b   : > { %v551_v63 = vmul.f32 %v549_v42, %v547_v45  ;;  %v550_v0 = vmul.f32 %v549_v42, %v545_v26 }
 0x14c   : > { %888 = vrot.lane.b32.xlu1 %v2350_v37, %s1805_s29  ;;  %886 = vrot.lane.b32.xlu0 %v2354_v40, %s1805_s29 }
 0x14d   : > { %v553_v9 = vadd.f32 %v551_v63, %v537_v4  ;;  %v552_v10 = vadd.f32 %v550_v0, %v536_v5  ;;  %v647_v0 = vstv %s2441_s17  ;;  %v641_v5 = vstv %s2447_s9  ;;  %s1437_s17 = sld [smem:[#allocation8 + $0x30]] }
 0x14e   : > { %v557_v1 = vpop.permute.xlu1 %556  ;;  %v555_v2 = vpop.permute.xlu0 %554  ;;  %s1438_s9 = sld [smem:[#allocation8 + $0x31]] }
 0x14f   : > { %v561_v6 = vmul.f32 %v559_v58, %v557_v1  ;;  %v560_v7 = vmul.f32 %v559_v58, %v555_v2 }
 0x150   : > { %903 = vrot.lane.b32.xlu1 %v2413_v59, %s1801_s26  ;;  %901 = vrot.lane.b32.xlu0 %v2417_v60, %s1801_s26 }
 0x151   : > { %v563_v39 = vadd.f32 %v561_v6, %v553_v9  ;;  %v562_v14 = vadd.f32 %v560_v7, %v552_v10  ;;  %v648_v10 = vmul.f32 %v647_v0, %v2189_v56  ;;  %v667_v56 = vstv %s1429_s8  ;;  %s2531_s8 = sld [smem:[#allocation8 + $0x33]] }
 0x152   : > { %v567_v12 = vpop.permute.xlu1 %566  ;;  %v565_v38 = vpop.permute.xlu0 %564 }
 0x153   : > { %v571_v15 = vmul.f32 %v569_v8, %v567_v12  ;;  %v570_v16 = vmul.f32 %v569_v8, %v565_v38  ;;  %v649_v8 = vmul.f32 %v647_v0, %v2185_v55 }
 0x154   : > { %913 = vrot.lane.b32.xlu1 %v2413_v59, %s1800_s15  ;;  %911 = vrot.lane.b32.xlu0 %v2417_v60, %s1800_s15 }
 0x155   : > { %v573_v17 = vadd.f32 %v571_v15, %v563_v39  ;;  %v572_v43 = vadd.f32 %v570_v16, %v562_v14  ;;  %v657_v16 = vstv %s2455_s24  ;;  %s2529_s24 = sld [smem:[#allocation8 + $0x32]] }
 0x156   : > { %v583_v44 = vpop.permute.xlu1 %582  ;;  %v581_v18 = vpop.permute.xlu0 %580 }
 0x157   : > { %v579_v48 = vadd.f32 %v577_v11, %v573_v17  ;;  %v578_v19 = vadd.f32 %v576_v13, %v572_v43  ;;  %v587_v30 = vmul.f32 %v585_v24, %v583_v44  ;;  %v586_v25 = vmul.f32 %v585_v24, %v581_v18 }
 0x158   : > { %923 = vrot.lane.b32.xlu1 %v2413_v59, %s1802_s5  ;;  %921 = vrot.lane.b32.xlu0 %v2417_v60, %s1802_s5 }
 0x159   : > { %v589_v42 = vadd.f32 %v587_v30, %v579_v48  ;;  %v588_v45 = vadd.f32 %v586_v25, %v578_v19 }
 0x15a   : > { %v593_v49 = vpop.permute.xlu1 %592  ;;  %v591_v23 = vpop.permute.xlu0 %590 }
 0x15b   : > { %v597_v33 = vmul.f32 %v595_v27, %v593_v49  ;;  %v596_v34 = vmul.f32 %v595_v27, %v591_v23  ;;  %v677_v27 = vstv %s1430_s20  ;;  %s2538_s20 = sld [smem:[#allocation8 + $0x34]] }
 0x15c   : > { %939 = vrot.lane.b32.xlu1 %v2413_v59, %s1803_s6  ;;  %937 = vrot.lane.b32.xlu0 %v2417_v60, %s1803_s6 }
 0x15d   : > { %v599_v52 = vadd.f32 %v597_v33, %v589_v42  ;;  %v598_v57 = vadd.f32 %v596_v34, %v588_v45 }
 0x15e   : > { %v603_v28 = vpop.permute.xlu1 %602  ;;  %v601_v29 = vpop.permute.xlu0 %600 }
 0x15f   : > { %v607_v26 = vmul.f32 %v605_v32, %v603_v28  ;;  %v606_v50 = vmul.f32 %v605_v32, %v601_v29 }
 0x160   : > { %949 = vrot.lane.b32.xlu1 %v2413_v59, %s1804_s21  ;;  %947 = vrot.lane.b32.xlu0 %v2417_v60, %s1804_s21 }
 0x161   : > { %v609_v1 = vadd.f32 %v607_v26, %v599_v52  ;;  %v608_v2 = vadd.f32 %v606_v50, %v598_v57  ;;  %v1035_v26 = vrot.slane %v2280_v22, 1  ;;  %v1033_v50 = vrot.slane %v2276_v20, 1 }
 0x162   : > { %v619_v36 = vpop.permute.xlu1 %618  ;;  %v617_v41 = vpop.permute.xlu0 %616 }
 0x163   : > { %v623_v58 = vmul.f32 %v621_v35, %v619_v36  ;;  %v622_v61 = vmul.f32 %v621_v35, %v617_v41  ;;  %v693_v36 = vstv %s2473_s7  ;;  %v1034_v41 = vrot.slane %v2278_v21, 1  ;;  %s2547_s7 = sld [smem:[#allocation8 + $0x35]] }
 0x164   : > { %959 = vrot.lane.b32.xlu1 %v2413_v59, %s1805_s29  ;;  %957 = vrot.lane.b32.xlu0 %v2417_v60, %s1805_s29 }
 0x165   : > { %v625_v6 = vadd.f32 %v623_v58, %v609_v1  ;;  %v624_v7 = vadd.f32 %v622_v61, %v608_v2  ;;  %v703_v61 = vstv %s2479_s4  ;;  %v2502_v0 = vsel %vm541_vm4, %v1034_v41, %v1035_v26  ;;  %s1443_s4 = sld [smem:[#allocation8 + $0x36]] }
 0x166   : > { %v629_v62 = vpop.permute.xlu1 %628  ;;  %v627_v63 = vpop.permute.xlu0 %626  ;;  %v2506_v1 = vsel %vm541_vm4, %v1033_v50, %v1034_v41 }
 0x167   : > { %v633_v3 = vmul.f32 %v631_v51, %v629_v62  ;;  %v632_v4 = vmul.f32 %v631_v51, %v627_v63 }
 0x168   : > { %969 = vrot.lane.b32.xlu1 %v2278_v21, %s1801_s26  ;;  %967 = vrot.lane.b32.xlu0 %v2276_v20, %s1801_s26 }
 0x169   : > { %v635_v12 = vadd.f32 %v633_v3, %v625_v6  ;;  %v634_v13 = vadd.f32 %v632_v4, %v624_v7  ;;  %v713_v6 = vstv %s2481_s30  ;;  %v719_v7 = vstv %s2489_s25  ;;  %s1444_s30 = sld [smem:[#allocation8 + $0x37]] }
 0x16a   : > { %v639_v9 = vpop.permute.xlu1 %638  ;;  %v637_v11 = vpop.permute.xlu0 %636  ;;  %s1445_s25 = sld [smem:[#allocation8 + $0x38]] }
 0x16b   : > { %v643_v38 = vmul.f32 %v641_v5, %v639_v9  ;;  %v642_v39 = vmul.f32 %v641_v5, %v637_v11 }
 0x16c   : > { %979 = vrot.lane.b32.xlu1 %v2278_v21, %s1800_s15  ;;  %977 = vrot.lane.b32.xlu0 %v2276_v20, %s1800_s15 }
 0x16d   : > { %v645_v14 = vadd.f32 %v643_v38, %v635_v12  ;;  %v644_v15 = vadd.f32 %v642_v39, %v634_v13  ;;  %v721_v12 = vmul.f32 %v719_v7, %v2242_v46  ;;  %v720_v38 = vmul.f32 %v719_v7, %v2246_v47 }
 0x16e   : > { %v655_v17 = vpop.permute.xlu1 %654  ;;  %v653_v55 = vpop.permute.xlu0 %652  ;;  %v739_v47 = vstv %s1436_s1  ;;  %v790_v7 = vstv %s2538_s20  ;;  %s2580_s1 = sld [smem:[#allocation8 + $0x3b]] }
 0x16f   : > { %v651_v43 = vadd.f32 %v649_v8, %v645_v14  ;;  %v650_v44 = vadd.f32 %v648_v10, %v644_v15  ;;  %v659_v18 = vmul.f32 %v657_v16, %v655_v17  ;;  %v658_v48 = vmul.f32 %v657_v16, %v653_v55  ;;  %s2626_s20 = sld [smem:[#allocation8 + $0x42]] }
 0x170   : > { %989 = vrot.lane.b32.xlu1 %v2278_v21, %s1802_s5  ;;  %987 = vrot.lane.b32.xlu0 %v2276_v20, %s1802_s5  ;;  %v729_v14 = vstv %s2498_s22  ;;  %s2578_s22 = sld [smem:[#allocation8 + $0x39]] }
 0x171   : > { %v661_v28 = vadd.f32 %v659_v18, %v651_v43  ;;  %v660_v29 = vadd.f32 %v658_v48, %v650_v44 }
 0x172   : > { %v665_v19 = vpop.permute.xlu1 %664  ;;  %v663_v49 = vpop.permute.xlu0 %662 }
 0x173   : > { %v669_v23 = vmul.f32 %v667_v56, %v665_v19  ;;  %v668_v24 = vmul.f32 %v667_v56, %v663_v49 }
 0x174   : > { %1005 = vrot.lane.b32.xlu1 %v2278_v21, %s1803_s6  ;;  %1003 = vrot.lane.b32.xlu0 %v2276_v20, %s1803_s6 }
 0x175   : > { %v671_v32 = vadd.f32 %v669_v23, %v661_v28  ;;  %v670_v33 = vadd.f32 %v668_v24, %v660_v29 }
 0x176   : > { %v675_v30 = vpop.permute.xlu1 %674  ;;  %v673_v25 = vpop.permute.xlu0 %672 }
 0x177   : > { %v679_v34 = vmul.f32 %v677_v27, %v675_v30  ;;  %v678_v35 = vmul.f32 %v677_v27, %v673_v25  ;;  %v749_v27 = vstv %s1437_s17  ;;  %s2589_s17 = sld [smem:[#allocation8 + $0x3a]] }
 0x178   : > { %1015 = vrot.lane.b32.xlu1 %v2278_v21, %s1804_s21  ;;  %1013 = vrot.lane.b32.xlu0 %v2276_v20, %s1804_s21 }
 0x179   : > { %v681_v42 = vadd.f32 %v679_v34, %v671_v32  ;;  %v680_v45 = vadd.f32 %v678_v35, %v670_v33  ;;  %v764_v34 = vstv %s1438_s9  ;;  %v1105_v35 = vrot.slane %v2278_v21, 2  ;;  %s1450_s9 = sld [smem:[#allocation8 + $0x3d]] }
 0x17a   : > { %v691_v51 = vpop.permute.xlu1 %690  ;;  %v689_v52 = vpop.permute.xlu0 %688 }
 0x17b   : > { %v695_v57 = vmul.f32 %v693_v36, %v691_v51  ;;  %v694_v58 = vmul.f32 %v693_v36, %v689_v52 }
 0x17c   : > { %1025 = vrot.lane.b32.xlu1 %v2278_v21, %s1805_s29  ;;  %1023 = vrot.lane.b32.xlu0 %v2276_v20, %s1805_s29 }
 0x17d   : > { %v697_v62 = vadd.f32 %v695_v57, %v681_v42  ;;  %v696_v63 = vadd.f32 %v694_v58, %v680_v45  ;;  %v1106_v42 = vrot.slane %v2280_v22, 2  ;;  %v1104_v45 = vrot.slane %v2276_v20, 2 }
 0x17e   : > { %v701_v2 = vpop.permute.xlu1 %700  ;;  %v699_v3 = vpop.permute.xlu0 %698  ;;  %v774_v57 = vstv %s2529_s24  ;;  %v855_v31 = vstv %s2589_s17  ;;  %s1451_s24 = sld [smem:[#allocation8 + $0x3e]] }
 0x17f   : > { %v705_v4 = vmul.f32 %v703_v61, %v701_v2  ;;  %v704_v5 = vmul.f32 %v703_v61, %v699_v3  ;;  %s1465_s17 = sld [smem:[#allocation8 + $0x4c]] }
 0x180   : > { %1040 = vrot.lane.b32.xlu1 %v2502_v0, %s1801_s26  ;;  %1038 = vrot.lane.b32.xlu0 %v2506_v1, %s1801_s26 }
 0x181   : > { %v707_v8 = vadd.f32 %v705_v4, %v697_v62  ;;  %v706_v9 = vadd.f32 %v704_v5, %v696_v63  ;;  %v2551_v62 = vsel %vm613_vm5, %v1105_v35, %v1106_v42  ;;  %v2555_v63 = vsel %vm613_vm5, %v1104_v45, %v1105_v35 }
 0x182   : > { %v711_v10 = vpop.permute.xlu1 %710  ;;  %v709_v11 = vpop.permute.xlu0 %708 }
 0x183   : > { %v715_v13 = vmul.f32 %v713_v6, %v711_v10  ;;  %v714_v39 = vmul.f32 %v713_v6, %v709_v11  ;;  %v784_v6 = vstv %s2531_s8  ;;  %s1452_s8 = sld [smem:[#allocation8 + $0x3f]] }
 0x184   : > { %1050 = vrot.lane.b32.xlu1 %v2502_v0, %s1800_s15  ;;  %1048 = vrot.lane.b32.xlu0 %v2506_v1, %s1800_s15 }
 0x185   : > { %v717_v15 = vadd.f32 %v715_v13, %v707_v8  ;;  %v716_v16 = vadd.f32 %v714_v39, %v706_v9 }
 0x186   : > { %v727_v17 = vpop.permute.xlu1 %726  ;;  %v725_v55 = vpop.permute.xlu0 %724 }
 0x187   : > { %v723_v43 = vadd.f32 %v721_v12, %v717_v15  ;;  %v722_v44 = vadd.f32 %v720_v38, %v716_v16  ;;  %v731_v56 = vmul.f32 %v729_v14, %v727_v17  ;;  %v730_v46 = vmul.f32 %v729_v14, %v725_v55 }
 0x188   : > { %1060 = vrot.lane.b32.xlu1 %v2502_v0, %s1802_s5  ;;  %1058 = vrot.lane.b32.xlu0 %v2506_v1, %s1802_s5  ;;  %v792_v12 = vmul.f32 %v790_v7, %v2303_v53  ;;  %v791_v38 = vmul.f32 %v790_v7, %v2307_v54  ;;  %v800_v14 = vstv %s2547_s7  ;;  %s1459_s7 = sld [smem:[#allocation8 + $0x46]] }
 0x189   : > { %v733_v18 = vadd.f32 %v731_v56, %v723_v43  ;;  %v732_v48 = vadd.f32 %v730_v46, %v722_v44 }
 0x18a   : > { %v737_v19 = vpop.permute.xlu1 %736  ;;  %v735_v49 = vpop.permute.xlu0 %734 }
 0x18b   : > { %v741_v23 = vmul.f32 %v739_v47, %v737_v19  ;;  %v740_v24 = vmul.f32 %v739_v47, %v735_v49 }
 0x18c   : > { %1076 = vrot.lane.b32.xlu1 %v2502_v0, %s1803_s6  ;;  %1074 = vrot.lane.b32.xlu0 %v2506_v1, %s1803_s6 }
 0x18d   : > { %v743_v28 = vadd.f32 %v741_v23, %v733_v18  ;;  %v742_v29 = vadd.f32 %v740_v24, %v732_v48  ;;  %v810_v48 = vstv %s1443_s4  ;;  %v820_v23 = vstv %s1444_s30  ;;  %s1460_s4 = sld [smem:[#allocation8 + $0x47]] }
 0x18e   : > { %v747_v30 = vpop.permute.xlu1 %746  ;;  %v745_v25 = vpop.permute.xlu0 %744  ;;  %v1176_v24 = vrot.slane %v2278_v21, 3  ;;  %s2643_s30 = sld [smem:[#allocation8 + $0x48]] }
 0x18f   : > { %v751_v32 = vmul.f32 %v749_v27, %v747_v30  ;;  %v750_v33 = vmul.f32 %v749_v27, %v745_v25  ;;  %v1177_v27 = vrot.slane %v2280_v22, 3  ;;  %v835_v25 = vstv %s1445_s25  ;;  %s2645_s25 = sld [smem:[#allocation8 + $0x49]] }
 0x190   : > { %1086 = vrot.lane.b32.xlu1 %v2502_v0, %s1804_s21  ;;  %1084 = vrot.lane.b32.xlu0 %v2506_v1, %s1804_s21 }
 0x191   : > { %v753_v36 = vadd.f32 %v751_v32, %v743_v28  ;;  %v752_v41 = vadd.f32 %v750_v33, %v742_v29  ;;  %v1175_v28 = vrot.slane %v2276_v20, 3  ;;  %v2598_v22 = vsel %vm685_vm6, %v1176_v24, %v1177_v27 }
 0x192   : > { %v762_v26 = vpop.permute.xlu1 %761  ;;  %v760_v50 = vpop.permute.xlu0 %759 }
 0x193   : > { %v766_v51 = vmul.f32 %v764_v34, %v762_v26  ;;  %v765_v52 = vmul.f32 %v764_v34, %v760_v50 }
 0x194   : > { %1096 = vrot.lane.b32.xlu1 %v2502_v0, %s1805_s29  ;;  %1094 = vrot.lane.b32.xlu0 %v2506_v1, %s1805_s29 }
 0x195   : > { %v768_v58 = vadd.f32 %v766_v51, %v753_v36  ;;  %v767_v61 = vadd.f32 %v765_v52, %v752_v41  ;;  %v845_v36 = vstv %s2578_s22  ;;  %v2602_v41 = vsel %vm685_vm6, %v1175_v28, %v1176_v24  ;;  %s2648_s22 = sld [smem:[#allocation8 + $0x4a]] }
 0x196   : > { %v772_v2 = vpop.permute.xlu1 %771  ;;  %v770_v3 = vpop.permute.xlu0 %769 }
 0x197   : > { %v776_v4 = vmul.f32 %v774_v57, %v772_v2  ;;  %v775_v5 = vmul.f32 %v774_v57, %v770_v3  ;;  %v861_v57 = vstv %s2580_s1  ;;  %s1464_s1 = sld [smem:[#allocation8 + $0x4b]] }
 0x198   : > { %1111 = vrot.lane.b32.xlu1 %v2551_v62, %s1801_s26  ;;  %1109 = vrot.lane.b32.xlu0 %v2555_v63, %s1801_s26 }
 0x199   : > { %v778_v8 = vadd.f32 %v776_v4, %v768_v58  ;;  %v777_v9 = vadd.f32 %v775_v5, %v767_v61 }
 0x19a   : > { %v782_v10 = vpop.permute.xlu1 %781  ;;  %v780_v11 = vpop.permute.xlu0 %779 }
 0x19b   : > { %v786_v13 = vmul.f32 %v784_v6, %v782_v10  ;;  %v785_v39 = vmul.f32 %v784_v6, %v780_v11  ;;  %v863_v6 = vmul.f32 %v861_v57, %v2350_v37 }
 0x19c   : > { %1121 = vrot.lane.b32.xlu1 %v2551_v62, %s1800_s15  ;;  %1119 = vrot.lane.b32.xlu0 %v2555_v63, %s1800_s15 }
 0x19d   : > { %v788_v15 = vadd.f32 %v786_v13, %v778_v8  ;;  %v787_v16 = vadd.f32 %v785_v39, %v777_v9  ;;  %v862_v8 = vmul.f32 %v861_v57, %v2354_v40 }
 0x19e   : > { %v798_v17 = vpop.permute.xlu1 %797  ;;  %v796_v55 = vpop.permute.xlu0 %795 }
 0x19f   : > { %v794_v43 = vadd.f32 %v792_v12, %v788_v15  ;;  %v793_v44 = vadd.f32 %v791_v38, %v787_v16  ;;  %v802_v56 = vmul.f32 %v800_v14, %v798_v17  ;;  %v801_v53 = vmul.f32 %v800_v14, %v796_v55 }
 0x1a0   : > { %1131 = vrot.lane.b32.xlu1 %v2551_v62, %s1802_s5  ;;  %1129 = vrot.lane.b32.xlu0 %v2555_v63, %s1802_s5 }
 0x1a1   : > { %v804_v54 = vadd.f32 %v802_v56, %v794_v43  ;;  %v803_v46 = vadd.f32 %v801_v53, %v793_v44  ;;  %v881_v43 = vstv %s1450_s9  ;;  %s2654_s9 = sld [smem:[#allocation8 + $0x4e]] }
 0x1a2   : > { %v808_v47 = vpop.permute.xlu1 %807  ;;  %v806_v18 = vpop.permute.xlu0 %805 }
 0x1a3   : > { %v812_v29 = vmul.f32 %v810_v48, %v808_v47  ;;  %v811_v30 = vmul.f32 %v810_v48, %v806_v18  ;;  %v906_v48 = vstv %s1452_s8  ;;  %s2658_s8 = sld [smem:[#allocation8 + $0x4f]] }
 0x1a4   : > { %1147 = vrot.lane.b32.xlu1 %v2551_v62, %s1803_s6  ;;  %1145 = vrot.lane.b32.xlu0 %v2555_v63, %s1803_s6 }
 0x1a5   : > { %v814_v42 = vadd.f32 %v812_v29, %v804_v54  ;;  %v813_v45 = vadd.f32 %v811_v30, %v803_v46  ;;  %v891_v46 = vstv %s1451_s24  ;;  %s2656_s24 = sld [smem:[#allocation8 + $0x50]] }
 0x1a6   : > { %v818_v19 = vpop.permute.xlu1 %817  ;;  %v816_v49 = vpop.permute.xlu0 %815 }
 0x1a7   : > { %v822_v34 = vmul.f32 %v820_v23, %v818_v19  ;;  %v821_v35 = vmul.f32 %v820_v23, %v816_v49 }
 0x1a8   : > { %1157 = vrot.lane.b32.xlu1 %v2551_v62, %s1804_s21  ;;  %1155 = vrot.lane.b32.xlu0 %v2555_v63, %s1804_s21 }
 0x1a9   : > { %v824_v58 = vadd.f32 %v822_v34, %v814_v42  ;;  %v823_v61 = vadd.f32 %v821_v35, %v813_v45 }
 0x1aa   : > { %v833_v32 = vpop.permute.xlu1 %832  ;;  %v831_v33 = vpop.permute.xlu0 %830 }
 0x1ab   : > { %v837_v26 = vmul.f32 %v835_v25, %v833_v32  ;;  %v836_v50 = vmul.f32 %v835_v25, %v831_v33 }
 0x1ac   : > { %1167 = vrot.lane.b32.xlu1 %v2551_v62, %s1805_s29  ;;  %1165 = vrot.lane.b32.xlu0 %v2555_v63, %s1805_s29 }
 0x1ad   : > { %v839_v4 = vadd.f32 %v837_v26, %v824_v58  ;;  %v838_v5 = vadd.f32 %v836_v50, %v823_v61 }
 0x1ae   : > { %v843_v51 = vpop.permute.xlu1 %842  ;;  %v841_v52 = vpop.permute.xlu0 %840 }
 0x1af   : > { %v847_v2 = vmul.f32 %v845_v36, %v843_v51  ;;  %v846_v3 = vmul.f32 %v845_v36, %v841_v52  ;;  %v932_v36 = vstv %s2626_s20  ;;  %s1471_s20 = sld [smem:[#allocation8 + $0x52]] }
 0x1b0   : > { %1182 = vrot.lane.b32.xlu1 %v2598_v22, %s1801_s26  ;;  %1180 = vrot.lane.b32.xlu0 %v2602_v41, %s1801_s26  ;;  %s1449_s26 = sld [smem:[#allocation8 + $0x3c]] }
 0x1b1   : > { %v849_v10 = vadd.f32 %v847_v2, %v839_v4  ;;  %v848_v11 = vadd.f32 %v846_v3, %v838_v5  ;;  %v934_v2 = vmul.f32 %v932_v36, %v2413_v59  ;;  %v933_v3 = vmul.f32 %v932_v36, %v2417_v60 }
 0x1b2   : > { %v853_v7 = vpop.permute.xlu1 %852  ;;  %v851_v9 = vpop.permute.xlu0 %850 }
 0x1b3   : > { %v857_v12 = vmul.f32 %v855_v31, %v853_v7  ;;  %v856_v13 = vmul.f32 %v855_v31, %v851_v9 }
 0x1b4   : > { %1192 = vrot.lane.b32.xlu1 %v2598_v22, %s1800_s15  ;;  %1190 = vrot.lane.b32.xlu0 %v2602_v41, %s1800_s15  ;;  %s2624_s15 = sld [smem:[#allocation8 + $0x40]] }
 0x1b5   : > { %v859_v38 = vadd.f32 %v857_v12, %v849_v10  ;;  %v858_v39 = vadd.f32 %v856_v13, %v848_v11 }
 0x1b6   : > { %v869_v14 = vpop.permute.xlu1 %868  ;;  %v867_v15 = vpop.permute.xlu0 %866  ;;  %v871_v55 = vstv %s1449_s26  ;;  %s1466_s26 = sld [smem:[#allocation8 + $0x4d]] }
 0x1b7   : > { %v865_v37 = vadd.f32 %v863_v6, %v859_v38  ;;  %v864_v16 = vadd.f32 %v862_v8, %v858_v39  ;;  %v873_v53 = vmul.f32 %v871_v55, %v869_v14  ;;  %v872_v54 = vmul.f32 %v871_v55, %v867_v15 }
 0x1b8   : > { %1202 = vrot.lane.b32.xlu1 %v2598_v22, %s1802_s5  ;;  %1200 = vrot.lane.b32.xlu0 %v2602_v41, %s1802_s5  ;;  %s2632_s5 = sld [smem:[#allocation8 + $0x41]] }
 0x1b9   : > { %v875_v23 = vadd.f32 %v873_v53, %v865_v37  ;;  %v874_v24 = vadd.f32 %v872_v54, %v864_v16  ;;  %v972_v53 = vstv %s1459_s7  ;;  %s2667_s7 = sld [smem:[#allocation8 + $0x56]] }
 0x1ba   : > { %v879_v40 = vpop.permute.xlu1 %878  ;;  %v877_v17 = vpop.permute.xlu0 %876  ;;  %v916_v29 = vstv %s2624_s15  ;;  %s1470_s15 = sld [smem:[#allocation8 + $0x51]] }
 0x1bb   : > { %v883_v47 = vmul.f32 %v881_v43, %v879_v40  ;;  %v882_v18 = vmul.f32 %v881_v43, %v877_v17 }
 0x1bc   : > { %1218 = vrot.lane.b32.xlu1 %v2598_v22, %s1803_s6  ;;  %1216 = vrot.lane.b32.xlu0 %v2602_v41, %s1803_s6  ;;  %s1456_s6 = sld [smem:[#allocation8 + $0x43]] }
 0x1bd   : > { %v885_v30 = vadd.f32 %v883_v47, %v875_v23  ;;  %v884_v25 = vadd.f32 %v882_v18, %v874_v24 }
 0x1be   : > { %v889_v44 = vpop.permute.xlu1 %888  ;;  %v887_v56 = vpop.permute.xlu0 %886  ;;  %v926_v51 = vstv %s2632_s5  ;;  %s1472_s5 = sld [smem:[#allocation8 + $0x53]] }
 0x1bf   : > { %v893_v27 = vmul.f32 %v891_v46, %v889_v44  ;;  %v892_v28 = vmul.f32 %v891_v46, %v887_v56 }
 0x1c0   : > { %1228 = vrot.lane.b32.xlu1 %v2598_v22, %s1804_s21  ;;  %1226 = vrot.lane.b32.xlu0 %v2602_v41, %s1804_s21  ;;  %s1457_s21 = sld [smem:[#allocation8 + $0x44]] }
 0x1c1   : > { %v895_v42 = vadd.f32 %v893_v27, %v885_v30  ;;  %v894_v45 = vadd.f32 %v892_v28, %v884_v25 }
 0x1c2   : > { %v904_v19 = vpop.permute.xlu1 %903  ;;  %v902_v49 = vpop.permute.xlu0 %901  ;;  %v942_v59 = vstv %s1456_s6  ;;  %s1473_s6 = sld [smem:[#allocation8 + $0x54]] }
 0x1c3   : > { %v908_v32 = vmul.f32 %v906_v48, %v904_v19  ;;  %v907_v33 = vmul.f32 %v906_v48, %v902_v49  ;;  %v982_v48 = vstv %s1460_s4  ;;  %s1477_s4 = sld [smem:[#allocation8 + $0x58]] }
 0x1c4   : > { %1238 = vrot.lane.b32.xlu1 %v2598_v22, %s1805_s29  ;;  %1236 = vrot.lane.b32.xlu0 %v2602_v41, %s1805_s29  ;;  %s1458_s29 = sld [smem:[#allocation8 + $0x45]] }
 0x1c5   : > { %v910_v52 = vadd.f32 %v908_v32, %v895_v42  ;;  %v909_v57 = vadd.f32 %v907_v33, %v894_v45 }
 0x1c6   : > { %v914_v34 = vpop.permute.xlu1 %913  ;;  %v912_v35 = vpop.permute.xlu0 %911  ;;  %v952_v37 = vstv %s1457_s21  ;;  %s1474_s21 = sld [smem:[#allocation8 + $0x55]] }
 0x1c7   : > { %v918_v26 = vmul.f32 %v916_v29, %v914_v34  ;;  %v917_v50 = vmul.f32 %v916_v29, %v912_v35  ;;  %v992_v29 = vstv %s2643_s30  ;;  %s1478_s30 = sld [smem:[#allocation8 + $0x59]] }
 0x1c9   : > { %v920_v31 = vadd.f32 %v918_v26, %v910_v52  ;;  %v919_v4 = vadd.f32 %v917_v50, %v909_v57  ;;  %v998_v50 = vstv %s2645_s25  ;;  %s1479_s25 = sld [smem:[#allocation8 + $0x5a]] }
 0x1ca   : > { %v924_v58 = vpop.permute.xlu1 %923  ;;  %v922_v61 = vpop.permute.xlu0 %921  ;;  %v962_v17 = vstv %s1458_s29  ;;  %s2665_s29 = sld [smem:[#allocation8 + $0x57]] }
 0x1cb   : > { %v928_v5 = vmul.f32 %v926_v51, %v924_v58  ;;  %v927_v6 = vmul.f32 %v926_v51, %v922_v61 }
 0x1cd   : > { %v930_v7 = vadd.f32 %v928_v5, %v920_v31  ;;  %v929_v8 = vadd.f32 %v927_v6, %v919_v4  ;;  %v999_v31 = vmul.f32 %v998_v50, %v2276_v20  ;;  %v1008_v4 = vstv %s2648_s22  ;;  %s1480_s22 = sld [smem:[#allocation8 + $0x5b]] }
 0x1ce   : > { %v940_v9 = vpop.permute.xlu1 %939  ;;  %v938_v10 = vpop.permute.xlu0 %937  ;;  %v1018_v5 = vstv %s1464_s1  ;;  %v1043_v20 = vstv %s1466_s26  ;;  %s1481_s1 = sld [smem:[#allocation8 + $0x5c]] }
 0x1cf   : > { %v936_v11 = vadd.f32 %v934_v2, %v930_v7  ;;  %v935_v12 = vadd.f32 %v933_v3, %v929_v8  ;;  %v944_v16 = vmul.f32 %v942_v59, %v940_v9  ;;  %v943_v40 = vmul.f32 %v942_v59, %v938_v10  ;;  %s2675_s26 = sld [smem:[#allocation8 + $0x5d]] }
 0x1d0   : > { %v1000_v3 = vmul.f32 %v998_v50, %v2278_v21  ;;  %v1079_v50 = vstv %s1470_s15 }
 0x1d1   : > { %v946_v54 = vadd.f32 %v944_v16, %v936_v11  ;;  %v945_v46 = vadd.f32 %v943_v40, %v935_v12  ;;  %v1028_v12 = vstv %s1465_s17  ;;  %s2673_s17 = sld [smem:[#allocation8 + $0x5e]] }
 0x1d2   : > { %v950_v13 = vpop.permute.xlu1 %949  ;;  %v948_v38 = vpop.permute.xlu0 %947 }
 0x1d3   : > { %v954_v44 = vmul.f32 %v952_v37, %v950_v13  ;;  %v953_v56 = vmul.f32 %v952_v37, %v948_v38  ;;  %v1053_v37 = vstv %s2654_s9  ;;  %s1484_s9 = sld [smem:[#allocation8 + $0x5f]] }
 0x1d5   : > { %v956_v23 = vadd.f32 %v954_v44, %v946_v54  ;;  %v955_v24 = vadd.f32 %v953_v56, %v945_v46  ;;  %v1069_v56 = vstv %s2656_s24  ;;  %s1485_s24 = sld [smem:[#allocation8 + $0x60]] }
 0x1d6   : > { %v960_v39 = vpop.permute.xlu1 %959  ;;  %v958_v14 = vpop.permute.xlu0 %957 }
 0x1d7   : > { %v964_v47 = vmul.f32 %v962_v17, %v960_v39  ;;  %v963_v18 = vmul.f32 %v962_v17, %v958_v14 }
 0x1d9   : > { %v966_v30 = vadd.f32 %v964_v47, %v956_v23  ;;  %v965_v25 = vadd.f32 %v963_v18, %v955_v24  ;;  %v1063_v18 = vstv %s2658_s8  ;;  %v1071_v24 = vmul.f32 %v1069_v56, %v2502_v0  ;;  %s1486_s8 = sld [smem:[#allocation8 + $0x61]] }
 0x1da   : > { %v970_v60 = vpop.permute.xlu1 %969  ;;  %v968_v15 = vpop.permute.xlu0 %967  ;;  %v1089_v0 = vstv %s1471_s20 }
 0x1db   : > { %v974_v27 = vmul.f32 %v972_v53, %v970_v60  ;;  %v973_v28 = vmul.f32 %v972_v53, %v968_v15 }
 0x1dd   : > { %v976_v36 = vadd.f32 %v974_v27, %v966_v30  ;;  %v975_v42 = vadd.f32 %v973_v28, %v965_v25  ;;  %v1070_v27 = vmul.f32 %v1069_v56, %v2506_v1 }
 0x1de   : > { %v980_v55 = vpop.permute.xlu1 %979  ;;  %v978_v43 = vpop.permute.xlu0 %977 }
 0x1df   : > { %v984_v32 = vmul.f32 %v982_v48, %v980_v55  ;;  %v983_v33 = vmul.f32 %v982_v48, %v978_v43 }
 0x1e1   : > { %v986_v51 = vadd.f32 %v984_v32, %v976_v36  ;;  %v985_v52 = vadd.f32 %v983_v33, %v975_v42 }
 0x1e2   : > { %v990_v19 = vpop.permute.xlu1 %989  ;;  %v988_v49 = vpop.permute.xlu0 %987 }
 0x1e3   : > { %v994_v45 = vmul.f32 %v992_v29, %v990_v19  ;;  %v993_v26 = vmul.f32 %v992_v29, %v988_v49 }
 0x1e5   : > { %v996_v61 = vadd.f32 %v994_v45, %v986_v51  ;;  %v995_v2 = vadd.f32 %v993_v26, %v985_v52 }
 0x1e6   : > { %v1006_v34 = vpop.permute.xlu1 %1005  ;;  %v1004_v35 = vpop.permute.xlu0 %1003 }
 0x1e7   : > { %v1002_v8 = vadd.f32 %v1000_v3, %v996_v61  ;;  %v1010_v9 = vmul.f32 %v1008_v4, %v1006_v34  ;;  %v1001_v10 = vadd.f32 %v999_v31, %v995_v2  ;;  %v1009_v11 = vmul.f32 %v1008_v4, %v1004_v35 }
 0x1e8   : > { %v1114_v3 = vstv %s1473_s6 }
 0x1e9   : > { %v1012_v14 = vadd.f32 %v1010_v9, %v1002_v8  ;;  %v1011_v59 = vadd.f32 %v1009_v11, %v1001_v10  ;;  %v1124_v9 = vstv %s1474_s21 }
 0x1ea   : > { %v1016_v57 = vpop.permute.xlu1 %1015  ;;  %v1014_v58 = vpop.permute.xlu0 %1013 }
 0x1eb   : > { %v1020_v13 = vmul.f32 %v1018_v5, %v1016_v57  ;;  %v1019_v21 = vmul.f32 %v1018_v5, %v1014_v58  ;;  %v1099_v58 = vstv %s1472_s5 }
 0x1ed   : > { %v1022_v16 = vadd.f32 %v1020_v13, %v1012_v14  ;;  %v1021_v40 = vadd.f32 %v1019_v21, %v1011_v59 }
 0x1ee   : > { %v1026_v6 = vpop.permute.xlu1 %1025  ;;  %v1024_v7 = vpop.permute.xlu0 %1023 }
 0x1ef   : > { %v1030_v60 = vmul.f32 %v1028_v12, %v1026_v6  ;;  %v1029_v15 = vmul.f32 %v1028_v12, %v1024_v7 }
 0x1f1   : > { %v1032_v53 = vadd.f32 %v1030_v60, %v1022_v16  ;;  %v1031_v54 = vadd.f32 %v1029_v15, %v1021_v40  ;;  %v1134_v15 = vstv %s2667_s7 }
 0x1f2   : > { %v1041_v38 = vpop.permute.xlu1 %1040  ;;  %v1039_v39 = vpop.permute.xlu0 %1038 }
 0x1f3   : > { %v1045_v17 = vmul.f32 %v1043_v20, %v1041_v38  ;;  %v1044_v55 = vmul.f32 %v1043_v20, %v1039_v39  ;;  %v1140_v38 = vstv %s2665_s29 }
 0x1f5   : > { %v1047_v48 = vadd.f32 %v1045_v17, %v1032_v53  ;;  %v1046_v19 = vadd.f32 %v1044_v55, %v1031_v54  ;;  %v1142_v55 = vmul.f32 %v1140_v38, %v2551_v62  ;;  %v1160_v62 = vstv %s1478_s30 }
 0x1f6   : > { %v1051_v43 = vpop.permute.xlu1 %1050  ;;  %v1049_v44 = vpop.permute.xlu0 %1048 }
 0x1f7   : > { %v1055_v46 = vmul.f32 %v1053_v37, %v1051_v43  ;;  %v1054_v47 = vmul.f32 %v1053_v37, %v1049_v44  ;;  %v1141_v43 = vmul.f32 %v1140_v38, %v2555_v63 }
 0x1f9   : > { %v1057_v28 = vadd.f32 %v1055_v46, %v1047_v48  ;;  %v1056_v29 = vadd.f32 %v1054_v47, %v1046_v19 }
 0x1fa   : > { %v1061_v49 = vpop.permute.xlu1 %1060  ;;  %v1059_v23 = vpop.permute.xlu0 %1058 }
 0x1fb   : > { %v1065_v30 = vmul.f32 %v1063_v18, %v1061_v49  ;;  %v1064_v25 = vmul.f32 %v1063_v18, %v1059_v23 }
 0x1fd   : > { %v1067_v32 = vadd.f32 %v1065_v30, %v1057_v28  ;;  %v1066_v33 = vadd.f32 %v1064_v25, %v1056_v29  ;;  %v1170_v25 = vstv %s1479_s25 }
 0x1fe   : > { %v1077_v34 = vpop.permute.xlu1 %1076  ;;  %v1075_v35 = vpop.permute.xlu0 %1074 }
 0x1ff   : > { %v1073_v36 = vadd.f32 %v1071_v24, %v1067_v32  ;;  %v1072_v42 = vadd.f32 %v1070_v27, %v1066_v33  ;;  %v1081_v52 = vmul.f32 %v1079_v50, %v1077_v34  ;;  %v1080_v57 = vmul.f32 %v1079_v50, %v1075_v35 }
 0x200   : > { %v1150_v27 = vstv %s1477_s4  ;;  %v1185_v34 = vstv %s1480_s22 }
 0x201   : > { %v1083_v5 = vadd.f32 %v1081_v52, %v1073_v36  ;;  %v1082_v6 = vadd.f32 %v1080_v57, %v1072_v42 }
 0x202   : > { %v1087_v45 = vpop.permute.xlu1 %1086  ;;  %v1085_v26 = vpop.permute.xlu0 %1084 }
 0x203   : > { %v1091_v61 = vmul.f32 %v1089_v0, %v1087_v45  ;;  %v1090_v2 = vmul.f32 %v1089_v0, %v1085_v26  ;;  %v1195_v0 = vstv %s1481_s1 }
 0x205   : > { %v1093_v10 = vadd.f32 %v1091_v61, %v1083_v5  ;;  %v1092_v11 = vadd.f32 %v1090_v2, %v1082_v6  ;;  %v1211_v2 = vstv %s2673_s17  ;;  %v1205_v6 = vstv %s2675_s26 }
 0x206   : > { %v1097_v1 = vpop.permute.xlu1 %1096  ;;  %v1095_v51 = vpop.permute.xlu0 %1094 }
 0x207   : > { %v1101_v7 = vmul.f32 %v1099_v58, %v1097_v1  ;;  %v1100_v8 = vmul.f32 %v1099_v58, %v1095_v51 }
 0x209   : > { %v1103_v39 = vadd.f32 %v1101_v7, %v1093_v10  ;;  %v1102_v14 = vadd.f32 %v1100_v8, %v1092_v11  ;;  %v1213_v11 = vmul.f32 %v1211_v2, %v2598_v22 }
 0x20a   : > { %v1112_v31 = vpop.permute.xlu1 %1111  ;;  %v1110_v4 = vpop.permute.xlu0 %1109 }
 0x20b   : > { %v1116_v12 = vmul.f32 %v1114_v3, %v1112_v31  ;;  %v1115_v13 = vmul.f32 %v1114_v3, %v1110_v4 }
 0x20d   : > { %v1118_v37 = vadd.f32 %v1116_v12, %v1103_v39  ;;  %v1117_v16 = vadd.f32 %v1115_v13, %v1102_v14  ;;  %v1212_v12 = vmul.f32 %v1211_v2, %v2602_v41  ;;  %v1241_v41 = vstv %s1486_s8 }
 0x20e   : > { %v1122_v21 = vpop.permute.xlu1 %1121  ;;  %v1120_v20 = vpop.permute.xlu0 %1119 }
 0x20f   : > { %v1126_v59 = vmul.f32 %v1124_v9, %v1122_v21  ;;  %v1125_v60 = vmul.f32 %v1124_v9, %v1120_v20 }
 0x211   : > { %v1128_v44 = vadd.f32 %v1126_v59, %v1118_v37  ;;  %v1127_v56 = vadd.f32 %v1125_v60, %v1117_v16  ;;  %v1221_v59 = vstv %s1484_s9 }
 0x212   : > { %v1132_v40 = vpop.permute.xlu1 %1131  ;;  %v1130_v17 = vpop.permute.xlu0 %1129 }
 0x213   : > { %v1136_v53 = vmul.f32 %v1134_v15, %v1132_v40  ;;  %v1135_v54 = vmul.f32 %v1134_v15, %v1130_v17  ;;  %v1231_v40 = vstv %s1485_s24 }
 0x215   : > { %v1138_v46 = vadd.f32 %v1136_v53, %v1128_v44  ;;  %v1137_v47 = vadd.f32 %v1135_v54, %v1127_v56 }
 0x216   : > { %v1148_v18 = vpop.permute.xlu1 %1147  ;;  %v1146_v48 = vpop.permute.xlu0 %1145 }
 0x217   : > { %v1144_v19 = vadd.f32 %v1142_v55, %v1138_v46  ;;  %v1143_v49 = vadd.f32 %v1141_v43, %v1137_v47  ;;  %v1152_v29 = vmul.f32 %v1150_v27, %v1148_v18  ;;  %v1151_v30 = vmul.f32 %v1150_v27, %v1146_v48 }
 0x219   : > { %v1154_v42 = vadd.f32 %v1152_v29, %v1144_v19  ;;  %v1153_v45 = vadd.f32 %v1151_v30, %v1143_v49 }
 0x21a   : > { %v1158_v23 = vpop.permute.xlu1 %1157  ;;  %v1156_v24 = vpop.permute.xlu0 %1155 }
 0x21b   : > { %v1162_v32 = vmul.f32 %v1160_v62, %v1158_v23  ;;  %v1161_v33 = vmul.f32 %v1160_v62, %v1156_v24 }
 0x21d   : > { %v1164_v1 = vadd.f32 %v1162_v32, %v1154_v42  ;;  %v1163_v51 = vadd.f32 %v1161_v33, %v1153_v45 }
 0x21e   : > { %v1168_v63 = vpop.permute.xlu1 %1167  ;;  %v1166_v28 = vpop.permute.xlu0 %1165 }
 0x21f   : > { %v1172_v26 = vmul.f32 %v1170_v25, %v1168_v63  ;;  %v1171_v50 = vmul.f32 %v1170_v25, %v1166_v28 }
 0x221   : > { %v1174_v3 = vadd.f32 %v1172_v26, %v1164_v1  ;;  %v1173_v31 = vadd.f32 %v1171_v50, %v1163_v51 }
 0x222   : > { %v1183_v35 = vpop.permute.xlu1 %1182  ;;  %v1181_v36 = vpop.permute.xlu0 %1180 }
 0x223   : > { %v1187_v52 = vmul.f32 %v1185_v34, %v1183_v35  ;;  %v1186_v57 = vmul.f32 %v1185_v34, %v1181_v36 }
 0x225   : > { %v1189_v7 = vadd.f32 %v1187_v52, %v1174_v3  ;;  %v1188_v8 = vadd.f32 %v1186_v57, %v1173_v31 }
 0x226   : > { %v1193_v58 = vpop.permute.xlu1 %1192  ;;  %v1191_v61 = vpop.permute.xlu0 %1190 }
 0x227   : > { %v1197_v4 = vmul.f32 %v1195_v0, %v1193_v58  ;;  %v1196_v5 = vmul.f32 %v1195_v0, %v1191_v61 }
 0x229   : > { %v1199_v13 = vadd.f32 %v1197_v4, %v1189_v7  ;;  %v1198_v21 = vadd.f32 %v1196_v5, %v1188_v8 }
 0x22a   : > { %v1203_v9 = vpop.permute.xlu1 %1202  ;;  %v1201_v10 = vpop.permute.xlu0 %1200 }
 0x22b   : > { %v1207_v20 = vmul.f32 %v1205_v6, %v1203_v9  ;;  %v1206_v38 = vmul.f32 %v1205_v6, %v1201_v10 }
 0x22d   : > { %v1209_v39 = vadd.f32 %v1207_v20, %v1199_v13  ;;  %v1208_v14 = vadd.f32 %v1206_v38, %v1198_v21 }
 0x22e   : > { %v1219_v60 = vpop.permute.xlu1 %1218  ;;  %v1217_v15 = vpop.permute.xlu0 %1216 }
 0x22f   : > { %v1215_v37 = vadd.f32 %v1213_v11, %v1209_v39  ;;  %v1214_v16 = vadd.f32 %v1212_v12, %v1208_v14  ;;  %v1223_v17 = vmul.f32 %v1221_v59, %v1219_v60  ;;  %v1222_v55 = vmul.f32 %v1221_v59, %v1217_v15 }
 0x231   : > { %v1225_v53 = vadd.f32 %v1223_v17, %v1215_v37  ;;  %v1224_v54 = vadd.f32 %v1222_v55, %v1214_v16 }
 0x232   : > { %v1229_v43 = vpop.permute.xlu1 %1228  ;;  %v1227_v44 = vpop.permute.xlu0 %1226 }
 0x233   : > { %v1233_v22 = vmul.f32 %v1231_v40, %v1229_v43  ;;  %v1232_v56 = vmul.f32 %v1231_v40, %v1227_v44 }
 0x235   : > { %v1235_v18 = vadd.f32 %v1233_v22, %v1225_v53  ;;  %v1234_v48 = vadd.f32 %v1232_v56, %v1224_v54 }
 0x236   : > { %v1239_v46 = vpop.permute.xlu1 %1238  ;;  %v1237_v47 = vpop.permute.xlu0 %1236 }
 0x237   : > { %v1243_v19 = vmul.f32 %v1241_v41, %v1239_v46  ;;  %v1242_v49 = vmul.f32 %v1241_v41, %v1237_v47 }
 0x239   : > { %v1245_v23 = vadd.f32 %v1243_v19, %v1235_v18  ;;  %v1244_v24 = vadd.f32 %v1242_v49, %v1234_v48 }
 0x23b   : > { %v1247_v27 = vsub.f32 0.0, %v1245_v23  ;;  %v1246_v62 = vsub.f32 0.0, %v1244_v24 }
 0x23d   : > { %v1250_v63 = vmul.f32 1.442695, %v1247_v27  ;;  %v1248_v28 = vmul.f32 1.442695, %v1246_v62 }
 0x23f   : > { %1618 = vpow2.f32 %v1250_v63 }
 0x240   : > { %1620 = vpow2.f32 %v1248_v28 }
 0x24c   : > { %v1619_v29 = vpop.eup %1618 }
 0x24d   : > { %v1621_v30 = vpop.eup %1620  ;;  %v1253_v25 = vadd.f32 1.0, %v1619_v29 }
 0x24e   : > { %v1252_v32 = vadd.f32 1.0, %v1621_v30 }
 0x24f   : > { %1622 = vrcp.f32 %v1253_v25 }
 0x250   : > { %1624 = vrcp.f32 %v1252_v32 }
 0x25c   : > { %v1623_v33 = vpop.eup %1622 }
 0x25d   : > { %v1625_v34 = vpop.eup %1624  ;;  %1259 = vst.msk [vmem:[%s1990_s23 + $0x8] sm:$0xff] %vm198_vm0, %v1623_v33 }
 0x25e   : > { %1258 = vst.msk [vmem:[%s1990_s23] sm:$0xff] %vm198_vm0, %v1625_v34 }
 0x25f PF: > { %s1493_s15 = sshll.u32 %s1781_s16, 8  ;;  %s1274_s21 = sshll.u32 %s1990_s23, 4  ;;  %s2692_s21 = int_to_ptr.vmem [resolvable:$true] %s1274_s21 }
 0x260   : > { %s2689_s6 = scalar_lea.hbm %s2758_s2, %s1493_s15  ;;  %s2696_s29 = scalar_lea.sflag [#allocation6], %s190_s28 }
 0x261   : > { %s1669_s7 = scalar_lea.vmem %s2692_s21, 256  ;;  %p2786_p0 = scmp.ne.s32.totalorder %s2775_s27, 0 }
 0x262   : > { %p1670_p12 = scmp.ne.s32.totalorder %s2692_s21, %s1669_s7  ;;  %s1806_s16 = smov [#allocation9]  }
 0x263   : > { %s1673_s4 = sshll.u32 %s1806_s16, 4  ;;  %s1674_s4 = int_to_ptr.vmem [resolvable:$false] %s1673_s4 }
 0x264   : > { %p1671_p1 = pnand %p1670_p12, %p2786_p0  ;;  %s1675_s30 = scalar_lea.vmem %s1674_s4, 512 }
 0x265   : > { %p1676_p5 = scmp.lt.s32.totalorder %s2692_s21, %s1674_s4  ;;  %p1677_p8 = scmp.lt.s32.totalorder %s1675_s30, %s1669_s7 }
 0x266   : > { %p1672_p2 = pneg %p1671_p1 }
 0x267   : > { %p1678_p9 = por %p1677_p8, %p1676_p5 }
 0x269   : > { %p1679_p11 = pnand %p1678_p9, %p1672_p2 }
 0x26b   : > { %1682 = shalt.err (!%p1679_p11)
}
 0x26c   : > { %s1683_s28 = scalar_lea.hbm %s2689_s6, 256  ;;  %s1687_s22 = scalar_lea.hbm %s2758_s2, 512 }
 0x26d   : > { %p1684_p13 = scmp.ne.s32.totalorder %s2689_s6, %s1683_s28  ;;  %p1688_p3 = scmp.lt.s32.totalorder %s2689_s6, %s2758_s2 }
 0x26e   : > { %p1689_p7 = scmp.lt.s32.totalorder %s1687_s22, %s1683_s28 }
 0x26f   : > { %p1685_p4 = pnand %p1684_p13, %p2786_p0 }
 0x270   : > { %p1690_p10 = por %p1689_p7, %p1688_p3 }
 0x271   : > { %p1686_p6 = pneg %p1685_p4 }
 0x273   : > { %p1691_p12 = pnand %p1690_p10, %p1686_p6 }
 0x275   : > { %1694 = shalt.err (!%p1691_p12)
}
 0x276   : > { %s1807_s26 = smov 128   ;;  %s1808_s9 = smov 8  }
 0x277   : > { %1500 = dma.vmem_to_hbm [thread:$0]  (%p2786_p0), %s2692_s21, 256, %s2689_s6, %s2696_s29, %s1807_s26, %s1807_s26, %s1808_s9  }
 0x278 PF: > { %s2787_s24 = sld [smem:[#allocation15_spill]] }
 0x279   : > { %s2788_s8 = sld [smem:[#allocation13_spill]] }
 0x27a   : > { %s2789_s15 = sld [smem:[#allocation16_spill]] }
 0x27e   : > { %p1517_p1 = scmp.ge.s32.totalorder %s2787_s24, 2 }
 0x27f   : > { %s1289_s20 = sand.u32 1, %s2788_s8  }
 0x280   : > { %p2790_p2 = scmp.ne.s32.totalorder %s2789_s15, 0  ;;  %s1290_s5 = scalar_lea.sflag [#allocation6], %s1289_s20 }
 0x282   : > { %p1511_p5 = pnand %p1517_p1, %p2790_p2 }
 0x284   : > { %p1512_p8 = pneg %p1511_p5 }
 0x286   : > { %1748 = dma.done.wait (%p1512_p8), %s1290_s5, 256  }
 0x287   : > { %1750 = vsyncadd (%p1512_p8), %s1290_s5, 4294967040  ;;  %s19_s7 = sadd.s32 1, %s2787_s24   ;;  %s2791_s15 = sld [smem:[#allocation14_spill]] }
 0x288   : > { %p16_p9 = scmp.ge.s32.totalorder %s19_s7, 6   ;;  %s2792_s17 = sld [smem:[#allocation17_spill]] }
 0x289   : > { %s2793_s27 = smov %s2808_s12  ;;  %s2794_s9 = smov %s1757_s10 }
 0x28a   : > { %s2795_s10 = smov %s1761_s11  ;;  %s2796_s11 = smov %s1953_s3 }
 0x28b   : > { %s2797_s12 = smov %s1769_s13  ;;  %s2798_s13 = smov %s1773_s14 }
 0x28c   : > { %s2799_s14 = smov %s1958_s19  ;;  %s2800_s16 = smov %s1789_s18 }
 0x28d   : > { %s2801_s18 = smov %s2793_s27  ;;  %s2802_s19 = smov %s19_s7 }
 0x28e   :  { %18 = sbr.rel (!%p16_p9) target bundleno = 12 (0xc), region = 90 }
 0x293   :  { %1295 = vsyncpa [#allocation5], 1 }
 0x294   :  { %1297 = vsyncpa [#allocation5 + $0x1], 1 }
 0x295   :  { %1298 = vsyncpa [#allocation6], 1 }
 0x296   :  { %1300 = vsyncpa [#allocation6 + $0x1], 1 }
 0x297   :  { %1301 = vsyncpa [#allocation7], 1 }
 0x298   :  { %1303 = vsyncpa [#allocation7 + $0x1], 1 }

</bundles_post_ra>
